<compile_context>
chip_gen: v6e
topology: v6e:2x2x1
jax: 0.10.0
libtpu: 0.0.40
codegen_flags: <defaults>
</compile_context>

<pallas_src>
import jax
import jax.numpy as jnp
from jax.experimental import pallas as pl
from jax.experimental.pallas import tpu as pltpu

IMG_FEAT = 1024       # GoogLeNet feature width (fixed by the reference module)
EMB_FEAT = 1500       # nn.Linear(num_question, 1500)
EMB_FEAT_PAD = 1536   # 1500 -> 12 * 128 (zero-padded question half)
K_TOTAL = IMG_FEAT + EMB_FEAT_PAD   # 2560 = 20 * 128
ACT_DTYPE = jnp.bfloat16            # streamed weight / activation dtype (f32 accumulation)


def _round_up(x, m):
    return (x + m - 1) // m * m


def _pick_tile(total, candidates):
    for c in candidates:
        if c <= total and total % c == 0:
            return c
    return total


def _act_kernel(gap_ref, q_ref, wimg_ref, bimg_ref, wemb_ref, bemb_ref, act_ref):
    """Branch linears + bias adds -> fused [tm, 2560] bf16 activation (computed once)."""
    # Image branch stand-in: Linear(C -> 1024) on the pooled image (f32 accumulate).
    feat = jnp.dot(gap_ref[...], wimg_ref[...],
                   preferred_element_type=jnp.float32) + bimg_ref[...]
    act_ref[:, :IMG_FEAT] = feat.astype(ACT_DTYPE)
    # Question branch: Linear(num_question -> 1500), zero-padded to 1536.
    emb = jnp.dot(q_ref[...], wemb_ref[...],
                  preferred_element_type=jnp.float32) + bemb_ref[...]
    act_ref[:, IMG_FEAT:] = emb.astype(ACT_DTYPE)


def _classifier_kernel(act_ref, wfc_ref, bfc_ref, out_ref):
    """out = act @ Wfc_tile + bfc_tile  (K grid collapsed -> no accumulator needed)."""
    out_ref[...] = (jnp.dot(act_ref[...], wfc_ref[...],
                            preferred_element_type=jnp.float32)
                    + bfc_ref[...]).astype(out_ref.dtype)


def simple_baseline_net(image, question, params, *, tn=512):
    """
    image:    [B, C, H, W] float32 (NCHW, as in PyTorch)
    question: [B, num_question] float32
    params:
        w_img [C, 1024], b_img [1024]            (stand-in for the googlenet features)
        w_emb [num_question, 1500], b_emb [1500] (self.embedding, stored as [in, out])
        w_fc  [2524, num_answer], b_fc [num_answer]   (self.fc, stored as [in, out])
    returns: [B, num_answer] float32
    """
    B, C, H, W = image.shape
    num_question = question.shape[1]
    num_answer = params["w_fc"].shape[1]
    assert params["w_fc"].shape[0] == IMG_FEAT + EMB_FEAT  # 2524
    assert tn % 128 == 0, "tn must be a multiple of 128 (lane-dense stores)"

    # ---- wrapper-side prep (cheap, mem-bound) ----
    # Global average pool over H, W (stand-in for the GoogLeNet feature extractor).
    gap = jnp.mean(image, axis=(2, 3))                       # [B, C]

    # Pad to (8/16, 128)-friendly shapes.  Padded rows/cols are zero, so the padded
    # matmuls are numerically identical to the unpadded ones.
    m_pad = _round_up(B, 16)                  # bf16 sublane packing
    if m_pad > 512:
        m_pad = _round_up(B, 512)             # allow big M tiles for large batches
    tm = min(512, m_pad)                      # fewer M tiles -> fewer w_fc re-streams
    c_pad = _round_up(C, 128)
    q_pad = _round_up(num_question, 128)
    n_pad = _round_up(num_answer, 128)
    tn = _pick_tile(n_pad, (tn, 512, 384, 256, 128))
    assert m_pad % tm == 0 and n_pad % tn == 0

    gap_p = jnp.zeros((m_pad, c_pad), ACT_DTYPE).at[:B, :C].set(gap.astype(ACT_DTYPE))
    q_p = jnp.zeros((m_pad, q_pad), ACT_DTYPE).at[:B, :num_question].set(
        question.astype(ACT_DTYPE))

    w_img = jnp.zeros((c_pad, IMG_FEAT), ACT_DTYPE).at[:C, :].set(
        params["w_img"].astype(ACT_DTYPE))
    b_img = params["b_img"].astype(jnp.float32).reshape(1, IMG_FEAT)

    w_emb = jnp.zeros((q_pad, EMB_FEAT_PAD), ACT_DTYPE).at[:num_question, :EMB_FEAT].set(
        params["w_emb"].astype(ACT_DTYPE))
    b_emb = jnp.zeros((1, EMB_FEAT_PAD), jnp.float32).at[0, :EMB_FEAT].set(
        params["b_emb"].astype(jnp.float32))

    # Classifier weight in split-concat layout: rows [0:1024] multiply the image
    # feature, rows [1024:2524] multiply the question embedding, rows [2524:2560) and
    # cols [num_answer:n_pad) are zero (so the split matmul == concat matmul exactly).
    w_fc = jnp.zeros((K_TOTAL, n_pad), ACT_DTYPE)
    w_fc = w_fc.at[:IMG_FEAT, :num_answer].set(params["w_fc"][:IMG_FEAT].astype(ACT_DTYPE))
    w_fc = w_fc.at[IMG_FEAT:IMG_FEAT + EMB_FEAT, :num_answer].set(
        params["w_fc"][IMG_FEAT:].astype(ACT_DTYPE))
    b_fc = jnp.zeros((1, n_pad), jnp.float32).at[0, :num_answer].set(
        params["b_fc"].astype(jnp.float32))

    nm, nn = m_pad // tm, n_pad // tn

    # ---- kernel 1: fused branch linears -> [m_pad, 2560] bf16 activation ----
    act = pl.pallas_call(
        _act_kernel,
        out_shape=jax.ShapeDtypeStruct((m_pad, K_TOTAL), ACT_DTYPE),
        grid_spec=pltpu.PrefetchScalarGridSpec(
            num_scalar_prefetch=0,
            grid=(nm,),
            in_specs=[
                pl.BlockSpec((tm, c_pad), lambda i: (i, 0)),            # pooled image
                pl.BlockSpec((tm, q_pad), lambda i: (i, 0)),            # question enc
                pl.BlockSpec((c_pad, IMG_FEAT), lambda i: (0, 0)),      # w_img (resident)
                pl.BlockSpec((1, IMG_FEAT), lambda i: (0, 0)),          # b_img
                pl.BlockSpec((q_pad, EMB_FEAT_PAD), lambda i: (0, 0)),  # w_emb (resident)
                pl.BlockSpec((1, EMB_FEAT_PAD), lambda i: (0, 0)),      # b_emb
            ],
            out_specs=pl.BlockSpec((tm, K_TOTAL), lambda i: (i, 0)),
        ),
        compiler_params=pltpu.CompilerParams(
            dimension_semantics=("parallel",),
            vmem_limit_bytes=48 * 1024 * 1024,
        ),
        cost_estimate=pl.CostEstimate(
            flops=2 * m_pad * (c_pad * IMG_FEAT + q_pad * EMB_FEAT_PAD),
            transcendentals=0,
            bytes_accessed=((gap_p.size + q_p.size + w_img.size + w_emb.size) * 2
                            + (b_img.size + b_emb.size) * 4
                            + m_pad * K_TOTAL * 2),
        ),
    )(gap_p, q_p, w_img, b_img, w_emb, b_emb)

    # ---- kernel 2: classifier, K grid collapsed (tk == 2560), bf16 weight stream ----
    out_pad = pl.pallas_call(
        _classifier_kernel,
        out_shape=jax.ShapeDtypeStruct((m_pad, n_pad), jnp.float32),
        grid_spec=pltpu.PrefetchScalarGridSpec(
            num_scalar_prefetch=0,
            grid=(nm, nn),
            in_specs=[
                pl.BlockSpec((tm, K_TOTAL), lambda i, j: (i, 0)),       # fused activation
                pl.BlockSpec((K_TOTAL, tn), lambda i, j: (0, j)),       # w_fc (streamed)
                pl.BlockSpec((1, tn), lambda i, j: (0, j)),             # b_fc
            ],
            out_specs=pl.BlockSpec((tm, tn), lambda i, j: (i, j)),
        ),
        compiler_params=pltpu.CompilerParams(
            # Both axes are independent output tiles -> shardable across TensorCores.
            dimension_semantics=("parallel", "parallel"),
            # Double-buffered tiles: w_fc 2*2560*tn*2 + act 2*tm*2560*2 + out 2*tm*tn*4
            # ~= 12 MiB at (tm, tn) = (512, 512); safe on v5e/v6e (128 MiB) and v7x (64 MiB).
            vmem_limit_bytes=48 * 1024 * 1024,
        ),
        cost_estimate=pl.CostEstimate(
            flops=2 * m_pad * K_TOTAL * n_pad,
            transcendentals=0,
            # w_fc / b_fc are re-streamed once per M tile.
            bytes_accessed=(nm * (w_fc.size * 2 + b_fc.size * 4)
                            + m_pad * K_TOTAL * 2 + m_pad * n_pad * 4),
        ),
    )(act, w_fc, b_fc)

    return out_pad[:B, :num_answer]


def _reference(image, question, params):
    """Pure-JAX reference with the same bf16 weight rounding / f32 accumulation."""
    bf = ACT_DTYPE
    gap = jnp.mean(image, axis=(2, 3)).astype(bf)
    feat = jnp.dot(gap, params["w_img"].astype(bf),
                   preferred_element_type=jnp.float32) + params["b_img"]
    emb = jnp.dot(question.astype(bf), params["w_emb"].astype(bf),
                  preferred_element_type=jnp.float32) + params["b_emb"]
    act = jnp.concatenate([feat, emb], axis=1).astype(bf)
    return jnp.dot(act, params["w_fc"].astype(bf),
                   preferred_element_type=jnp.float32) + params["b_fc"]


if __name__ == "__main__":
    key = jax.random.PRNGKey(0)
    B, C, H, W = 2, 4, 16, 16
    num_question, num_answer = 8, 32

    ks = jax.random.split(key, 8)
    image = jax.random.normal(ks[0], (B, C, H, W), jnp.float32)
    question = jax.random.normal(ks[1], (B, num_question), jnp.float32)

    scale = 0.05
    params = {
        "w_img": scale * jax.random.normal(ks[2], (C, IMG_FEAT), jnp.float32),
        "b_img": scale * jax.random.normal(ks[3], (IMG_FEAT,), jnp.float32),
        "w_emb": scale * jax.random.normal(ks[4], (num_question, EMB_FEAT), jnp.float32),
        "b_emb": scale * jax.random.normal(ks[5], (EMB_FEAT,), jnp.float32),
        "w_fc": scale * jax.random.normal(ks[6], (IMG_FEAT + EMB_FEAT, num_answer),
                                          jnp.float32),
        "b_fc": scale * jax.random.normal(ks[7], (num_answer,), jnp.float32),
    }

    out = jax.block_until_ready(jax.jit(simple_baseline_net)(image, question, params))
    ref = jax.block_until_ready(_reference(image, question, params))

    assert out.shape == (B, num_answer), out.shape
    max_err = float(jnp.max(jnp.abs(out - ref)))
    assert max_err < 5e-2, f"max abs error vs reference too large: {max_err}"
    print("KERNEL_OK")
</pallas_src>

<mosaic_0001>
module attributes {stable_mosaic.version = 11 : i64} {
  func.func @_act_kernel(%arg0: i32, %arg1: memref<16x128xbf16, #tpu.memory_space<vmem>>, %arg2: memref<16x128xbf16, #tpu.memory_space<vmem>>, %arg3: memref<128x1024xbf16, #tpu.memory_space<vmem>>, %arg4: memref<1x1024xf32, #tpu.memory_space<vmem>>, %arg5: memref<128x1536xbf16, #tpu.memory_space<vmem>>, %arg6: memref<1x1536xf32, #tpu.memory_space<vmem>>, %arg7: memref<16x2560xbf16, #tpu.memory_space<vmem>>) attributes {dimension_semantics = [#tpu.dimension_semantics<parallel>], iteration_bounds = array<i64: 1>, scalar_prefetch = 0 : i64, scratch_operands = 0 : i64, tpu.core_type = #tpu.core_type<tc>, window_params = [{transform_indices = @transform_0, window_bounds = array<i64: 16, 128>}, {transform_indices = @transform_1, window_bounds = array<i64: 16, 128>}, {pipeline_mode = #tpu.pipeline_mode<synchronous>, transform_indices = @transform_2, window_bounds = array<i64: 128, 1024>}, {pipeline_mode = #tpu.pipeline_mode<synchronous>, transform_indices = @transform_3, window_bounds = array<i64: 1, 1024>}, {pipeline_mode = #tpu.pipeline_mode<synchronous>, transform_indices = @transform_4, window_bounds = array<i64: 128, 1536>}, {pipeline_mode = #tpu.pipeline_mode<synchronous>, transform_indices = @transform_5, window_bounds = array<i64: 1, 1536>}, {transform_indices = @transform_6, window_bounds = array<i64: 16, 2560>}]} {
    %c0 = arith.constant 0 : index
    %c0_0 = arith.constant 0 : index
    %0 = vector.load %arg1[%c0, %c0_0] : memref<16x128xbf16, #tpu.memory_space<vmem>>, vector<16x128xbf16>
    %c0_1 = arith.constant 0 : index
    %c0_2 = arith.constant 0 : index
    %1 = vector.load %arg3[%c0_1, %c0_2] : memref<128x1024xbf16, #tpu.memory_space<vmem>>, vector<128x1024xbf16>
    %cst = arith.constant dense<0.000000e+00> : vector<16x1024xf32>
    %2 = tpu.matmul %0, %1, %cst {dimension_numbers = #tpu.dot_dimension_numbers<[1], [0], [0], [1], [0, 0, 1, 1], [], []>} : vector<16x128xbf16>, vector<128x1024xbf16>, vector<16x1024xf32> -> vector<16x1024xf32>
    %c0_3 = arith.constant 0 : index
    %c0_4 = arith.constant 0 : index
    %3 = vector.load %arg4[%c0_3, %c0_4] : memref<1x1024xf32, #tpu.memory_space<vmem>>, vector<1x1024xf32>
    %4 = vector.broadcast %3 : vector<1x1024xf32> to vector<16x1024xf32>
    %5 = arith.addf %2, %4 : vector<16x1024xf32>
    %6 = arith.truncf %5 : vector<16x1024xf32> to vector<16x1024xbf16>
    %c0_5 = arith.constant 0 : index
    %c0_6 = arith.constant 0 : index
    %7 = vector.load %arg7[%c0_5, %c0_6] : memref<16x2560xbf16, #tpu.memory_space<vmem>>, vector<16x1024xbf16>
    tpu.vector_store %arg7[%c0_5, %c0_6], %6 {strides = array<i32>} : memref<16x2560xbf16, #tpu.memory_space<vmem>>, vector<16x1024xbf16>,
    %c0_7 = arith.constant 0 : index
    %c0_8 = arith.constant 0 : index
    %8 = vector.load %arg2[%c0_7, %c0_8] : memref<16x128xbf16, #tpu.memory_space<vmem>>, vector<16x128xbf16>
    %c0_9 = arith.constant 0 : index
    %c0_10 = arith.constant 0 : index
    %9 = vector.load %arg5[%c0_9, %c0_10] : memref<128x1536xbf16, #tpu.memory_space<vmem>>, vector<128x1536xbf16>
    %cst_11 = arith.constant dense<0.000000e+00> : vector<16x1536xf32>
    %10 = tpu.matmul %8, %9, %cst_11 {dimension_numbers = #tpu.dot_dimension_numbers<[1], [0], [0], [1], [0, 0, 1, 1], [], []>} : vector<16x128xbf16>, vector<128x1536xbf16>, vector<16x1536xf32> -> vector<16x1536xf32>
    %c0_12 = arith.constant 0 : index
    %c0_13 = arith.constant 0 : index
    %11 = vector.load %arg6[%c0_12, %c0_13] : memref<1x1536xf32, #tpu.memory_space<vmem>>, vector<1x1536xf32>
    %12 = vector.broadcast %11 : vector<1x1536xf32> to vector<16x1536xf32>
    %13 = arith.addf %10, %12 : vector<16x1536xf32>
    %14 = arith.truncf %13 : vector<16x1536xf32> to vector<16x1536xbf16>
    %c0_14 = arith.constant 0 : index
    %c1024 = arith.constant 1024 : index
    %15 = vector.load %arg7[%c0_14, %c1024] : memref<16x2560xbf16, #tpu.memory_space<vmem>>, vector<16x1536xbf16>
    tpu.vector_store %arg7[%c0_14, %c1024], %14 {strides = array<i32>} : memref<16x2560xbf16, #tpu.memory_space<vmem>>, vector<16x1536xbf16>,
    return
  }
  func.func @transform_0(%arg0: i32) -> (i32, i32) {
    %c0_i32 = arith.constant 0 : i32
    %c0_i32_0 = arith.constant 0 : i32
    return %arg0, %c0_i32 : i32, i32
  }
  func.func @transform_1(%arg0: i32) -> (i32, i32) {
    %c0_i32 = arith.constant 0 : i32
    %c0_i32_0 = arith.constant 0 : i32
    return %arg0, %c0_i32 : i32, i32
  }
  func.func @transform_2(%arg0: i32) -> (i32, i32) {
    %c0_i32 = arith.constant 0 : i32
    %c0_i32_0 = arith.constant 0 : i32
    %c0_i32_1 = arith.constant 0 : i32
    return %c0_i32, %c0_i32_0 : i32, i32
  }
  func.func @transform_3(%arg0: i32) -> (i32, i32) {
    %c0_i32 = arith.constant 0 : i32
    %c0_i32_0 = arith.constant 0 : i32
    %c0_i32_1 = arith.constant 0 : i32
    return %c0_i32, %c0_i32_0 : i32, i32
  }
  func.func @transform_4(%arg0: i32) -> (i32, i32) {
    %c0_i32 = arith.constant 0 : i32
    %c0_i32_0 = arith.constant 0 : i32
    %c0_i32_1 = arith.constant 0 : i32
    return %c0_i32, %c0_i32_0 : i32, i32
  }
  func.func @transform_5(%arg0: i32) -> (i32, i32) {
    %c0_i32 = arith.constant 0 : i32
    %c0_i32_0 = arith.constant 0 : i32
    %c0_i32_1 = arith.constant 0 : i32
    return %c0_i32, %c0_i32_0 : i32, i32
  }
  func.func @transform_6(%arg0: i32) -> (i32, i32) {
    %c0_i32 = arith.constant 0 : i32
    %c0_i32_0 = arith.constant 0 : i32
    return %arg0, %c0_i32 : i32, i32
  }
}

module attributes {stable_mosaic.version = 11 : i64} {
  func.func @_classifier_kernel(%arg0: i32, %arg1: i32, %arg2: memref<16x2560xbf16, #tpu.memory_space<vmem>>, %arg3: memref<2560x128xbf16, #tpu.memory_space<vmem>>, %arg4: memref<1x128xf32, #tpu.memory_space<vmem>>, %arg5: memref<16x128xf32, #tpu.memory_space<vmem>>) attributes {dimension_semantics = [#tpu.dimension_semantics<parallel>, #tpu.dimension_semantics<parallel>], iteration_bounds = array<i64: 1, 1>, scalar_prefetch = 0 : i64, scratch_operands = 0 : i64, tpu.core_type = #tpu.core_type<tc>, window_params = [{transform_indices = @transform_0, window_bounds = array<i64: 16, 2560>}, {transform_indices = @transform_1, window_bounds = array<i64: 2560, 128>}, {transform_indices = @transform_2, window_bounds = array<i64: 1, 128>}, {transform_indices = @transform_3, window_bounds = array<i64: 16, 128>}]} {
    %c0 = arith.constant 0 : index
    %c0_0 = arith.constant 0 : index
    %0 = vector.load %arg2[%c0, %c0_0] : memref<16x2560xbf16, #tpu.memory_space<vmem>>, vector<16x2560xbf16>
    %c0_1 = arith.constant 0 : index
    %c0_2 = arith.constant 0 : index
    %1 = vector.load %arg3[%c0_1, %c0_2] : memref<2560x128xbf16, #tpu.memory_space<vmem>>, vector<2560x128xbf16>
    %cst = arith.constant dense<0.000000e+00> : vector<16x128xf32>
    %2 = tpu.matmul %0, %1, %cst {dimension_numbers = #tpu.dot_dimension_numbers<[1], [0], [0], [1], [0, 0, 1, 1], [], []>} : vector<16x2560xbf16>, vector<2560x128xbf16>, vector<16x128xf32> -> vector<16x128xf32>
    %c0_3 = arith.constant 0 : index
    %c0_4 = arith.constant 0 : index
    %3 = vector.load %arg4[%c0_3, %c0_4] : memref<1x128xf32, #tpu.memory_space<vmem>>, vector<1x128xf32>
    %4 = vector.broadcast %3 : vector<1x128xf32> to vector<16x128xf32>
    %5 = arith.addf %2, %4 : vector<16x128xf32>
    %c0_5 = arith.constant 0 : index
    %c0_6 = arith.constant 0 : index
    %6 = vector.load %arg5[%c0_5, %c0_6] : memref<16x128xf32, #tpu.memory_space<vmem>>, vector<16x128xf32>
    tpu.vector_store %arg5[%c0_5, %c0_6], %5 {strides = array<i32>} : memref<16x128xf32, #tpu.memory_space<vmem>>, vector<16x128xf32>,
    return
  }
  func.func @transform_0(%arg0: i32, %arg1: i32) -> (i32, i32) {
    %c0_i32 = arith.constant 0 : i32
    %c0_i32_0 = arith.constant 0 : i32
    return %arg0, %c0_i32 : i32, i32
  }
  func.func @transform_1(%arg0: i32, %arg1: i32) -> (i32, i32) {
    %c0_i32 = arith.constant 0 : i32
    %c0_i32_0 = arith.constant 0 : i32
    return %c0_i32, %arg1 : i32, i32
  }
  func.func @transform_2(%arg0: i32, %arg1: i32) -> (i32, i32) {
    %c0_i32 = arith.constant 0 : i32
    %c0_i32_0 = arith.constant 0 : i32
    return %c0_i32, %arg1 : i32, i32
  }
  func.func @transform_3(%arg0: i32, %arg1: i32) -> (i32, i32) {
    %c0_i32 = arith.constant 0 : i32
    return %arg0, %arg1 : i32, i32
  }
}

</mosaic_0001>

<bundles_post_ra>
// kernel: simple_baseline_net.2
= control target key start
LH: loop header
LB: loop body
LE: loop exit
PB: predicated region body
PF: predicated region fallthrough
CT: control target
= control target key end

     0   :  { %v2029_v3 = vmov 0   ;;  %s2678_s2 = inlined_call_operand.vmem [shape: bf16[128,1024], index: 2, kind: input, shape index: {}]   ;;  %s2679_s0 = inlined_call_operand.vmem [shape: bf16[16,128], index: 0, kind: input, shape index: {}]   ;;  %s2680_s4 = inlined_call_operand.vmem [shape: bf16[128,1536], index: 4, kind: input, shape index: {}]   ;;  %s2681_s1 = inlined_call_operand.vmem [shape: bf16[16,128], index: 1, kind: input, shape index: {}]   ;;  %s2682_s3 = inlined_call_operand.vmem [shape: f32[1,1024], index: 3, kind: input, shape index: {}]   ;;  %s2683_s6 = inlined_call_operand.vmem [shape: bf16[16,2560], index: 6, kind: output, shape index: {}]   ;;  %s2684_s5 = inlined_call_operand.vmem [shape: f32[1,1536], index: 5, kind: input, shape index: {}]  }
   0x1   :  { %v82_v0 = vld [vmem:[%s2678_s2 + $0x1c0] sm:$0xff]  ;;  %v83_v2 = vld [vmem:[%s2678_s2 + $0x1c8] sm:$0xff]  ;;  %490 = vmatprep.mubr.bf16.mxu0 %v2029_v3  ;;  %533 = vmatprep.mubr.bf16.mxu1 %v2029_v3  ;;  %v84_v62 = vld [vmem:[%s2678_s2 + $0x1d0] sm:$0xff] }
   0x2   :  { %v86_v1 = vld [vmem:[%s2678_s2 + $0x1e0] sm:$0xff]  ;;  %v87_v5 = vld [vmem:[%s2678_s2 + $0x1e8] sm:$0xff] }
   0x3   :  { %v1738_v4 = vcombine.high %v82_v0, %v86_v1  ;;  %v1737_v6 = vcombine.low %v82_v0, %v86_v1  ;;  %v74_v7 = vld [vmem:[%s2678_s2 + $0x180] sm:$0xff]  ;;  %v1740_v9 = vcombine.high %v83_v2, %v87_v5  ;;  %v1739_v10 = vcombine.low %v83_v2, %v87_v5  ;;  %v75_v12 = vld [vmem:[%s2678_s2 + $0x188] sm:$0xff]  ;;  %v88_v0 = vld [vmem:[%s2678_s2 + $0x1f0] sm:$0xff] }
   0x4   :  { %v78_v8 = vld [vmem:[%s2678_s2 + $0x1a0] sm:$0xff]  ;;  %v79_v13 = vld [vmem:[%s2678_s2 + $0x1a8] sm:$0xff]  ;;  %v85_v1 = vld [vmem:[%s2678_s2 + $0x1d8] sm:$0xff] }
   0x5   :  { %v1730_v11 = vcombine.high %v74_v7, %v78_v8  ;;  %v66_v14 = vld [vmem:[%s2678_s2 + $0x140] sm:$0xff]  ;;  %458 = vmatprep.subr.bf16.mxu0 %v1738_v4  ;;  %v1732_v15 = vcombine.high %v75_v12, %v79_v13  ;;  %v67_v17 = vld [vmem:[%s2678_s2 + $0x148] sm:$0xff]  ;;  %501 = vmatprep.subr.bf16.mxu1 %v1740_v9  ;;  %v1729_v19 = vcombine.low %v74_v7, %v78_v8  ;;  %v89_v2 = vld [vmem:[%s2678_s2 + $0x1f8] sm:$0xff] }
   0x6   :  { %v70_v16 = vld [vmem:[%s2678_s2 + $0x160] sm:$0xff]  ;;  %v71_v18 = vld [vmem:[%s2678_s2 + $0x168] sm:$0xff]  ;;  %459 = vmatpush1.bf16.msra.mxu0 %v1737_v6  ;;  %502 = vmatpush1.bf16.msra.mxu1 %v1739_v10  ;;  %v1731_v20 = vcombine.low %v75_v12, %v79_v13  ;;  %v1742_v7 = vcombine.high %v84_v62, %v88_v0  ;;  %v76_v8 = vld [vmem:[%s2678_s2 + $0x190] sm:$0xff]  ;;  %v1744_v9 = vcombine.high %v85_v1, %v89_v2 }
   0x7   :  { %460 = vmatprep.subr.bf16.mxu0 %v1730_v11  ;;  %v1722_v21 = vcombine.high %v66_v14, %v70_v16  ;;  %503 = vmatprep.subr.bf16.mxu1 %v1732_v15  ;;  %v1724_v22 = vcombine.high %v67_v17, %v71_v18  ;;  %v58_v23 = vld [vmem:[%s2678_s2 + $0x100] sm:$0xff]  ;;  %v59_v25 = vld [vmem:[%s2678_s2 + $0x108] sm:$0xff]  ;;  %v1721_v27 = vcombine.low %v66_v14, %v70_v16  ;;  %v80_v10 = vld [vmem:[%s2678_s2 + $0x1b0] sm:$0xff] }
   0x8   :  { %v62_v24 = vld [vmem:[%s2678_s2 + $0x120] sm:$0xff]  ;;  %v63_v26 = vld [vmem:[%s2678_s2 + $0x128] sm:$0xff]  ;;  %v1723_v28 = vcombine.low %v67_v17, %v71_v18  ;;  %v77_v11 = vld [vmem:[%s2678_s2 + $0x198] sm:$0xff]  ;;  %v1741_v13 = vcombine.low %v84_v62, %v88_v0  ;;  %v1743_v14 = vcombine.low %v85_v1, %v89_v2  ;;  %v1734_v15 = vcombine.high %v76_v8, %v80_v10 }
   0x9   :  { %v1714_v29 = vcombine.high %v58_v23, %v62_v24  ;;  %v1716_v30 = vcombine.high %v59_v25, %v63_v26  ;;  %v50_v31 = vld [vmem:[%s2678_s2 + $0xc0] sm:$0xff]  ;;  %v51_v33 = vld [vmem:[%s2678_s2 + $0xc8] sm:$0xff]  ;;  %v1713_v35 = vcombine.low %v58_v23, %v62_v24  ;;  %v1715_v36 = vcombine.low %v59_v25, %v63_v26  ;;  %v81_v12 = vld [vmem:[%s2678_s2 + $0x1b8] sm:$0xff] }
   0xa   :  { %461 = vmatpush1.bf16.msra.mxu0 %v1729_v19  ;;  %504 = vmatpush1.bf16.msra.mxu1 %v1731_v20  ;;  %v54_v32 = vld [vmem:[%s2678_s2 + $0xe0] sm:$0xff]  ;;  %v55_v34 = vld [vmem:[%s2678_s2 + $0xe8] sm:$0xff]  ;;  %v68_v16 = vld [vmem:[%s2678_s2 + $0x150] sm:$0xff]  ;;  %v1736_v17 = vcombine.high %v77_v11, %v81_v12 }
   0xb   :  { %462 = vmatprep.subr.bf16.mxu0 %v1722_v21  ;;  %505 = vmatprep.subr.bf16.mxu1 %v1724_v22  ;;  %v1706_v37 = vcombine.high %v50_v31, %v54_v32  ;;  %v1708_v38 = vcombine.high %v51_v33, %v55_v34  ;;  %v42_v39 = vld [vmem:[%s2678_s2 + $0x80] sm:$0xff]  ;;  %v43_v41 = vld [vmem:[%s2678_s2 + $0x88] sm:$0xff]  ;;  %v1705_v43 = vcombine.low %v50_v31, %v54_v32  ;;  %v72_v18 = vld [vmem:[%s2678_s2 + $0x170] sm:$0xff] }
   0xc   :  { %v46_v40 = vld [vmem:[%s2678_s2 + $0xa0] sm:$0xff]  ;;  %v47_v42 = vld [vmem:[%s2678_s2 + $0xa8] sm:$0xff]  ;;  %v1707_v44 = vcombine.low %v51_v33, %v55_v34  ;;  %v69_v19 = vld [vmem:[%s2678_s2 + $0x158] sm:$0xff]  ;;  %v1733_v21 = vcombine.low %v76_v8, %v80_v10  ;;  %v1735_v22 = vcombine.low %v77_v11, %v81_v12  ;;  %v1726_v23 = vcombine.high %v68_v16, %v72_v18 }
   0xd   :  { %v1698_v45 = vcombine.high %v42_v39, %v46_v40  ;;  %v1700_v46 = vcombine.high %v43_v41, %v47_v42  ;;  %v34_v47 = vld [vmem:[%s2678_s2 + $0x40] sm:$0xff]  ;;  %v35_v49 = vld [vmem:[%s2678_s2 + $0x48] sm:$0xff]  ;;  %v1697_v51 = vcombine.low %v42_v39, %v46_v40  ;;  %v1699_v52 = vcombine.low %v43_v41, %v47_v42  ;;  %v73_v20 = vld [vmem:[%s2678_s2 + $0x178] sm:$0xff] }
   0xe   :  { %463 = vmatpush1.bf16.msra.mxu0 %v1721_v27  ;;  %506 = vmatpush1.bf16.msra.mxu1 %v1723_v28  ;;  %v38_v48 = vld [vmem:[%s2678_s2 + $0x60] sm:$0xff]  ;;  %v39_v50 = vld [vmem:[%s2678_s2 + $0x68] sm:$0xff]  ;;  %v60_v24 = vld [vmem:[%s2678_s2 + $0x110] sm:$0xff]  ;;  %v1728_v25 = vcombine.high %v69_v19, %v73_v20 }
   0xf   :  { %464 = vmatprep.subr.bf16.mxu0 %v1714_v29  ;;  %507 = vmatprep.subr.bf16.mxu1 %v1716_v30  ;;  %v1690_v53 = vcombine.high %v34_v47, %v38_v48  ;;  %v26_v54 = vld [vmem:[%s2678_s2] sm:$0xff]  ;;  %v1692_v55 = vcombine.high %v35_v49, %v39_v50  ;;  %v27_v57 = vld [vmem:[%s2678_s2 + $0x8] sm:$0xff]  ;;  %v1689_v59 = vcombine.low %v34_v47, %v38_v48  ;;  %v64_v26 = vld [vmem:[%s2678_s2 + $0x130] sm:$0xff] }
  0x10   :  { %v30_v56 = vld [vmem:[%s2678_s2 + $0x20] sm:$0xff]  ;;  %v31_v58 = vld [vmem:[%s2678_s2 + $0x28] sm:$0xff]  ;;  %v1691_v60 = vcombine.low %v35_v49, %v39_v50  ;;  %v61_v27 = vld [vmem:[%s2678_s2 + $0x118] sm:$0xff]  ;;  %v1725_v29 = vcombine.low %v68_v16, %v72_v18  ;;  %v1727_v30 = vcombine.low %v69_v19, %v73_v20  ;;  %v1718_v31 = vcombine.high %v60_v24, %v64_v26 }
  0x11   :  { %v1682_v61 = vcombine.high %v26_v54, %v30_v56  ;;  %v1684_v63 = vcombine.high %v27_v57, %v31_v58  ;;  %v1681_v4 = vcombine.low %v26_v54, %v30_v56  ;;  %v1683_v5 = vcombine.low %v27_v57, %v31_v58  ;;  %v2178_v6 = vld [vmem:[%s2679_s0] sm:$0xff]   ;;  %v65_v28 = vld [vmem:[%s2678_s2 + $0x138] sm:$0xff]  ;;  %v52_v32 = vld [vmem:[%s2678_s2 + $0xd0] sm:$0xff] }
  0x12   :  { %465 = vmatpush1.bf16.msra.mxu0 %v1713_v35  ;;  %508 = vmatpush1.bf16.msra.mxu1 %v1715_v36  ;;  %v1720_v33 = vcombine.high %v61_v27, %v65_v28  ;;  %v56_v34 = vld [vmem:[%s2678_s2 + $0xf0] sm:$0xff]  ;;  %v53_v35 = vld [vmem:[%s2678_s2 + $0xd8] sm:$0xff] }
  0x13   :  { %466 = vmatprep.subr.bf16.mxu0 %v1706_v37  ;;  %509 = vmatprep.subr.bf16.mxu1 %v1708_v38  ;;  %v57_v36 = vld [vmem:[%s2678_s2 + $0xf8] sm:$0xff]  ;;  %v1717_v37 = vcombine.low %v60_v24, %v64_v26  ;;  %v1719_v38 = vcombine.low %v61_v27, %v65_v28  ;;  %v1710_v39 = vcombine.high %v52_v32, %v56_v34  ;;  %v44_v40 = vld [vmem:[%s2678_s2 + $0x90] sm:$0xff] }
  0x14   :  { %v48_v41 = vld [vmem:[%s2678_s2 + $0xb0] sm:$0xff]  ;;  %v1712_v42 = vcombine.high %v53_v35, %v57_v36  ;;  %v1887_v8 = vld [vmem:[%s2680_s4 + $0x2a8] ss:$48 sps:$4 sm:$0xff]   ;;  %v1895_v10 = vld [vmem:[%s2680_s4 + $0x24c] ss:$48 sps:$4 sm:$0xff]  }
  0x15   :  { %v1702_v47 = vcombine.high %v44_v40, %v48_v41  ;;  %v36_v48 = vld [vmem:[%s2678_s2 + $0x50] sm:$0xff]  ;;  %v1893_v12 = vld [vmem:[%s2680_s4 + $0x248] ss:$48 sps:$4 sm:$0xff]  }
  0x16   :  { %467 = vmatpush1.bf16.msra.mxu0 %v1705_v43  ;;  %510 = vmatpush1.bf16.msra.mxu1 %v1707_v44  ;;  %v45_v43 = vld [vmem:[%s2678_s2 + $0x98] sm:$0xff]  ;;  %v40_v49 = vld [vmem:[%s2678_s2 + $0x70] sm:$0xff] }
  0x17   :  { %468 = vmatprep.subr.bf16.mxu0 %v1698_v45  ;;  %511 = vmatprep.subr.bf16.mxu1 %v1700_v46  ;;  %v49_v44 = vld [vmem:[%s2678_s2 + $0xb8] sm:$0xff]  ;;  %v1709_v45 = vcombine.low %v52_v32, %v56_v34  ;;  %v1711_v46 = vcombine.low %v53_v35, %v57_v36  ;;  %v28_v56 = vld [vmem:[%s2678_s2 + $0x10] sm:$0xff] }
  0x18   :  { %v1704_v50 = vcombine.high %v45_v43, %v49_v44  ;;  %v1703_v54 = vcombine.low %v45_v43, %v49_v44  ;;  %v32_v57 = vld [vmem:[%s2678_s2 + $0x30] sm:$0xff]  ;;  %v1905_v19 = vld [vmem:[%s2680_s4 + $0x188] ss:$48 sps:$4 sm:$0xff]  }
  0x19   :  { %v1685_v1 = vcombine.low %v28_v56, %v32_v57  ;;  %v1890_v11 = vld [vmem:[%s2680_s4 + $0x240] ss:$48 sps:$4 sm:$0xff]   ;;  %v1904_v16 = vld [vmem:[%s2680_s4 + $0x184] ss:$48 sps:$4 sm:$0xff]   ;;  %v1917_v27 = vld [vmem:[%s2680_s4 + $0xc8] ss:$48 sps:$4 sm:$0xff]  }
  0x1a   :  { %469 = vmatpush1.bf16.msra.mxu0 %v1697_v51  ;;  %512 = vmatpush1.bf16.msra.mxu1 %v1699_v52  ;;  %v37_v51 = vld [vmem:[%s2678_s2 + $0x58] sm:$0xff]  ;;  %v1902_v18 = vld [vmem:[%s2680_s4 + $0x180] ss:$48 sps:$4 sm:$0xff]   ;;  %v1910_v20 = vld [vmem:[%s2680_s4 + $0x124] ss:$48 sps:$4 sm:$0xff]  }
  0x1b   :  { %470 = vmatprep.subr.bf16.mxu0 %v1690_v53  ;;  %513 = vmatprep.subr.bf16.mxu1 %v1692_v55  ;;  %v41_v52 = vld [vmem:[%s2678_s2 + $0x78] sm:$0xff]  ;;  %v1701_v53 = vcombine.low %v44_v40, %v48_v41  ;;  %v1694_v55 = vcombine.high %v36_v48, %v40_v49  ;;  %v1916_v24 = vld [vmem:[%s2680_s4 + $0xc4] ss:$48 sps:$4 sm:$0xff]   ;;  %v1914_v26 = vld [vmem:[%s2680_s4 + $0xc0] ss:$48 sps:$4 sm:$0xff]  }
  0x1c   :  { %v1696_v58 = vcombine.high %v37_v51, %v41_v52  ;;  %v1695_v62 = vcombine.low %v37_v51, %v41_v52  ;;  %v1922_v28 = vld [vmem:[%s2680_s4 + $0x64] ss:$48 sps:$4 sm:$0xff]   ;;  %v1926_v34 = vld [vmem:[%s2680_s4] ss:$48 sps:$4 sm:$0xff]   ;;  %v1929_v35 = vld [vmem:[%s2680_s4 + $0x8] ss:$48 sps:$4 sm:$0xff]  }
  0x1d   :  { %v1928_v32 = vld [vmem:[%s2680_s4 + $0x4] ss:$48 sps:$4 sm:$0xff]   ;;  %v1936_v40 = vld [vmem:[%s2680_s4 + $0x2b8] ss:$48 sps:$4 sm:$0xff]   ;;  %v1939_v43 = vld [vmem:[%s2680_s4 + $0x250] ss:$48 sps:$4 sm:$0xff]  }
  0x1e   :  { %471 = vmatpush1.bf16.msra.mxu0 %v1689_v59  ;;  %514 = vmatpush1.bf16.msra.mxu1 %v1691_v60  ;;  %v29_v59 = vld [vmem:[%s2678_s2 + $0x18] sm:$0xff]  ;;  %v1935_v36 = vld [vmem:[%s2680_s4 + $0x2b4] ss:$48 sps:$4 sm:$0xff]   ;;  %v1951_v51 = vld [vmem:[%s2680_s4 + $0x190] ss:$48 sps:$4 sm:$0xff]  }
  0x1f   :  { %472 = vmatprep.subr.bf16.mxu0 %v1682_v61  ;;  %515 = vmatprep.subr.bf16.mxu1 %v1684_v63  ;;  %v33_v60 = vld [vmem:[%s2678_s2 + $0x38] sm:$0xff]  ;;  %v1693_v61 = vcombine.low %v36_v48, %v40_v49  ;;  %v1686_v63 = vcombine.high %v28_v56, %v32_v57  ;;  %v1941_v41 = vld [vmem:[%s2680_s4 + $0x254] ss:$48 sps:$4 sm:$0xff]  }
  0x20   :  { %v1688_v0 = vcombine.high %v29_v59, %v33_v60  ;;  %v1687_v2 = vcombine.low %v29_v59, %v33_v60  ;;  %v1942_v44 = vld [vmem:[%s2680_s4 + $0x258] ss:$48 sps:$4 sm:$0xff]   ;;  %v1953_v49 = vld [vmem:[%s2680_s4 + $0x194] ss:$48 sps:$4 sm:$0xff]   ;;  %v1963_v59 = vld [vmem:[%s2680_s4 + $0xd0] ss:$48 sps:$4 sm:$0xff]  }
  0x21   :  { %v1948_v48 = vld [vmem:[%s2680_s4 + $0x1f8] ss:$48 sps:$4 sm:$0xff]   ;;  %v1965_v57 = vld [vmem:[%s2680_s4 + $0xd4] ss:$48 sps:$4 sm:$0xff]  }
  0x22   :  { %473 = vmatpush1.bf16.msra.mxu0 %v1681_v4  ;;  %516 = vmatpush1.bf16.msra.mxu1 %v1683_v5  ;;  %v1886_v4 = vld [vmem:[%s2680_s4 + $0x2a4] ss:$48 sps:$4 sm:$0xff]   ;;  %v1889_v5 = vld [vmem:[%s2680_s4 + $0x2ac] ss:$48 sps:$4 sm:$0xff]   ;;  %v1954_v52 = vld [vmem:[%s2680_s4 + $0x198] ss:$48 sps:$4 sm:$0xff]  }
  0x23   :  { %544 = vmatprep.subr.bf16.mxu0 %v1742_v7  ;;  %587 = vmatprep.subr.bf16.mxu1 %v1744_v9  ;;  %v1884_v7 = vld [vmem:[%s2680_s4 + $0x2a0] ss:$48 sps:$4 sm:$0xff]   ;;  %v1892_v9 = vld [vmem:[%s2680_s4 + $0x244] ss:$48 sps:$4 sm:$0xff]   ;;  %v1960_v56 = vld [vmem:[%s2680_s4 + $0x138] ss:$48 sps:$4 sm:$0xff]  }
  0x24   :  { %v1966_v60 = vld [vmem:[%s2680_s4 + $0xd8] ss:$48 sps:$4 sm:$0xff]  }
  0x25   :  { %491 = vmatmul.mubr.bf16.vlgmr.msra.gmra.mxu0 %v2178_v6  ;;  %534 = vmatmul.mubr.bf16.vlgmr.msra.gmra.mxu1 %v2178_v6 }
  0x26   :  { %545 = vmatpush1.bf16.msra.mxu0 %v1741_v13  ;;  %588 = vmatpush1.bf16.msra.mxu1 %v1743_v14  ;;  %v1898_v13 = vld [vmem:[%s2680_s4 + $0x1e4] ss:$48 sps:$4 sm:$0xff]   ;;  %v1896_v14 = vld [vmem:[%s2680_s4 + $0x1e0] ss:$48 sps:$4 sm:$0xff]  }
  0x27   :  { %546 = vmatprep.subr.bf16.mxu0 %v1734_v15  ;;  %589 = vmatprep.subr.bf16.mxu1 %v1736_v17  ;;  %v1899_v15 = vld [vmem:[%s2680_s4 + $0x1e8] ss:$48 sps:$4 sm:$0xff]   ;;  %v1907_v17 = vld [vmem:[%s2680_s4 + $0x18c] ss:$48 sps:$4 sm:$0xff]  }
  0x28   :  { %576 = vmatprep.mubr.bf16.mxu0 %v2029_v3  ;;  %619 = vmatprep.mubr.bf16.mxu1 %v2029_v3 }
  0x2a   :  { %547 = vmatpush1.bf16.msra.mxu0 %v1733_v21  ;;  %590 = vmatpush1.bf16.msra.mxu1 %v1735_v22  ;;  %v1913_v21 = vld [vmem:[%s2680_s4 + $0x12c] ss:$48 sps:$4 sm:$0xff]   ;;  %v1908_v22 = vld [vmem:[%s2680_s4 + $0x120] ss:$48 sps:$4 sm:$0xff]  }
  0x2b   :  { %548 = vmatprep.subr.bf16.mxu0 %v1726_v23  ;;  %591 = vmatprep.subr.bf16.mxu1 %v1728_v25  ;;  %v1911_v23 = vld [vmem:[%s2680_s4 + $0x128] ss:$48 sps:$4 sm:$0xff]   ;;  %v1919_v25 = vld [vmem:[%s2680_s4 + $0xcc] ss:$48 sps:$4 sm:$0xff]  }
  0x2e   :  { %549 = vmatpush1.bf16.msra.mxu0 %v1725_v29  ;;  %592 = vmatpush1.bf16.msra.mxu1 %v1727_v30  ;;  %v1925_v29 = vld [vmem:[%s2680_s4 + $0x6c] ss:$48 sps:$4 sm:$0xff]   ;;  %v1920_v30 = vld [vmem:[%s2680_s4 + $0x60] ss:$48 sps:$4 sm:$0xff]  }
  0x2f   :  { %550 = vmatprep.subr.bf16.mxu0 %v1718_v31  ;;  %593 = vmatprep.subr.bf16.mxu1 %v1720_v33  ;;  %v1923_v31 = vld [vmem:[%s2680_s4 + $0x68] ss:$48 sps:$4 sm:$0xff]   ;;  %v1931_v33 = vld [vmem:[%s2680_s4 + $0xc] ss:$48 sps:$4 sm:$0xff]  }
  0x32   :  { %551 = vmatpush1.bf16.msra.mxu0 %v1717_v37  ;;  %594 = vmatpush1.bf16.msra.mxu1 %v1719_v38  ;;  %v1938_v37 = vld [vmem:[%s2680_s4 + $0x2bc] ss:$48 sps:$4 sm:$0xff]   ;;  %v2377_v38 = vld [vmem:[%s2681_s1] sm:$0xff]  }
  0x33   :  { %552 = vmatprep.subr.bf16.mxu0 %v1710_v39  ;;  %595 = vmatprep.subr.bf16.mxu1 %v1712_v42  ;;  %v1933_v39 = vld [vmem:[%s2680_s4 + $0x2b0] ss:$48 sps:$4 sm:$0xff]   ;;  %v1944_v42 = vld [vmem:[%s2680_s4 + $0x25c] ss:$48 sps:$4 sm:$0xff]  }
  0x36   :  { %553 = vmatpush1.bf16.msra.mxu0 %v1709_v45  ;;  %596 = vmatpush1.bf16.msra.mxu1 %v1711_v46  ;;  %v1947_v45 = vld [vmem:[%s2680_s4 + $0x1f4] ss:$48 sps:$4 sm:$0xff]   ;;  %v1950_v46 = vld [vmem:[%s2680_s4 + $0x1fc] ss:$48 sps:$4 sm:$0xff]  }
  0x37   :  { %554 = vmatprep.subr.bf16.mxu0 %v1702_v47  ;;  %597 = vmatprep.subr.bf16.mxu1 %v1704_v50  ;;  %v1945_v47 = vld [vmem:[%s2680_s4 + $0x1f0] ss:$48 sps:$4 sm:$0xff]   ;;  %v1956_v50 = vld [vmem:[%s2680_s4 + $0x19c] ss:$48 sps:$4 sm:$0xff]  }
  0x3a   :  { %555 = vmatpush1.bf16.msra.mxu0 %v1701_v53  ;;  %598 = vmatpush1.bf16.msra.mxu1 %v1703_v54  ;;  %v1959_v53 = vld [vmem:[%s2680_s4 + $0x134] ss:$48 sps:$4 sm:$0xff]   ;;  %v1962_v54 = vld [vmem:[%s2680_s4 + $0x13c] ss:$48 sps:$4 sm:$0xff]  }
  0x3b   :  { %556 = vmatprep.subr.bf16.mxu0 %v1694_v55  ;;  %599 = vmatprep.subr.bf16.mxu1 %v1696_v58  ;;  %v1957_v55 = vld [vmem:[%s2680_s4 + $0x130] ss:$48 sps:$4 sm:$0xff]   ;;  %v1968_v58 = vld [vmem:[%s2680_s4 + $0xdc] ss:$48 sps:$4 sm:$0xff]  }
  0x3e   :  { %557 = vmatpush1.bf16.msra.mxu0 %v1693_v61  ;;  %600 = vmatpush1.bf16.msra.mxu1 %v1695_v62  ;;  %v1971_v61 = vld [vmem:[%s2680_s4 + $0x74] ss:$48 sps:$4 sm:$0xff]   ;;  %v1974_v62 = vld [vmem:[%s2680_s4 + $0x7c] ss:$48 sps:$4 sm:$0xff]  }
  0x3f   :  { %558 = vmatprep.subr.bf16.mxu0 %v1686_v63  ;;  %601 = vmatprep.subr.bf16.mxu1 %v1688_v0  ;;  %v1969_v63 = vld [vmem:[%s2680_s4 + $0x70] ss:$48 sps:$4 sm:$0xff]   ;;  %v1972_v0 = vld [vmem:[%s2680_s4 + $0x78] ss:$48 sps:$4 sm:$0xff]  }
  0x42   :  { %559 = vmatpush1.bf16.msra.mxu0 %v1685_v1  ;;  %602 = vmatpush1.bf16.msra.mxu1 %v1687_v2  ;;  %v1977_v1 = vld [vmem:[%s2680_s4 + $0x14] ss:$48 sps:$4 sm:$0xff]   ;;  %v1980_v2 = vld [vmem:[%s2680_s4 + $0x1c] ss:$48 sps:$4 sm:$0xff]  }
  0x43   :  { %1334 = vmatprep.subr.bf16.mxu0 %v1886_v4  ;;  %1377 = vmatprep.subr.bf16.mxu1 %v1889_v5  ;;  %v1975_v4 = vld [vmem:[%s2680_s4 + $0x10] ss:$48 sps:$4 sm:$0xff]   ;;  %v1978_v5 = vld [vmem:[%s2680_s4 + $0x18] ss:$48 sps:$4 sm:$0xff]  }
  0x45   :  { %577 = vmatmul.mubr.bf16.vlgmr.msra.gmra.mxu0 %v2178_v6  ;;  %620 = vmatmul.mubr.bf16.vlgmr.msra.gmra.mxu1 %v2178_v6  ;;  %v1901_v6 = vld [vmem:[%s2680_s4 + $0x1ec] ss:$48 sps:$4 sm:$0xff]  }
  0x46   :  { %1335 = vmatpush1.bf16.msra.mxu0 %v1884_v7  ;;  %1378 = vmatpush1.bf16.msra.mxu1 %v1887_v8  ;;  %v1983_v7 = vld [vmem:[%s2680_s4 + $0x2c4] ss:$48 sps:$4 sm:$0xff]   ;;  %v1986_v8 = vld [vmem:[%s2680_s4 + $0x2cc] ss:$48 sps:$4 sm:$0xff]  }
  0x47   :  { %1336 = vmatprep.subr.bf16.mxu0 %v1892_v9  ;;  %1379 = vmatprep.subr.bf16.mxu1 %v1895_v10  ;;  %v1981_v9 = vld [vmem:[%s2680_s4 + $0x2c0] ss:$48 sps:$4 sm:$0xff]   ;;  %v1984_v10 = vld [vmem:[%s2680_s4 + $0x2c8] ss:$48 sps:$4 sm:$0xff]  }
  0x48   :  { %1366 = vmatprep.mubr.bf16.mxu0 %v2029_v3  ;;  %1409 = vmatprep.mubr.bf16.mxu1 %v2029_v3 }
  0x4a   :  { %1337 = vmatpush1.bf16.msra.mxu0 %v1890_v11  ;;  %1380 = vmatpush1.bf16.msra.mxu1 %v1893_v12  ;;  %v1989_v11 = vld [vmem:[%s2680_s4 + $0x264] ss:$48 sps:$4 sm:$0xff]   ;;  %v1992_v12 = vld [vmem:[%s2680_s4 + $0x26c] ss:$48 sps:$4 sm:$0xff]  }
  0x4b   :  { %1338 = vmatprep.subr.bf16.mxu0 %v1898_v13  ;;  %1381 = vmatprep.subr.bf16.mxu1 %v1901_v6  ;;  %v1987_v13 = vld [vmem:[%s2680_s4 + $0x260] ss:$48 sps:$4 sm:$0xff]   ;;  %v1990_v6 = vld [vmem:[%s2680_s4 + $0x268] ss:$48 sps:$4 sm:$0xff]  }
  0x4e   :  { %1339 = vmatpush1.bf16.msra.mxu0 %v1896_v14  ;;  %1382 = vmatpush1.bf16.msra.mxu1 %v1899_v15  ;;  %v1995_v14 = vld [vmem:[%s2680_s4 + $0x204] ss:$48 sps:$4 sm:$0xff]   ;;  %v1998_v15 = vld [vmem:[%s2680_s4 + $0x20c] ss:$48 sps:$4 sm:$0xff]  }
  0x4f   :  { %1340 = vmatprep.subr.bf16.mxu0 %v1904_v16  ;;  %1383 = vmatprep.subr.bf16.mxu1 %v1907_v17  ;;  %v1993_v16 = vld [vmem:[%s2680_s4 + $0x200] ss:$48 sps:$4 sm:$0xff]   ;;  %v1996_v17 = vld [vmem:[%s2680_s4 + $0x208] ss:$48 sps:$4 sm:$0xff]  }
  0x52   :  { %1341 = vmatpush1.bf16.msra.mxu0 %v1902_v18  ;;  %1384 = vmatpush1.bf16.msra.mxu1 %v1905_v19  ;;  %v2001_v18 = vld [vmem:[%s2680_s4 + $0x1a4] ss:$48 sps:$4 sm:$0xff]   ;;  %v1999_v19 = vld [vmem:[%s2680_s4 + $0x1a0] ss:$48 sps:$4 sm:$0xff]  }
  0x53   :  { %1342 = vmatprep.subr.bf16.mxu0 %v1910_v20  ;;  %1385 = vmatprep.subr.bf16.mxu1 %v1913_v21  ;;  %v2002_v20 = vld [vmem:[%s2680_s4 + $0x1a8] ss:$48 sps:$4 sm:$0xff]   ;;  %v2007_v21 = vld [vmem:[%s2680_s4 + $0x144] ss:$48 sps:$4 sm:$0xff]  }
  0x56   :  { %1343 = vmatpush1.bf16.msra.mxu0 %v1908_v22  ;;  %1386 = vmatpush1.bf16.msra.mxu1 %v1911_v23  ;;  %v2010_v22 = vld [vmem:[%s2680_s4 + $0x14c] ss:$48 sps:$4 sm:$0xff]   ;;  %v2005_v23 = vld [vmem:[%s2680_s4 + $0x140] ss:$48 sps:$4 sm:$0xff]  }
  0x57   :  { %1344 = vmatprep.subr.bf16.mxu0 %v1916_v24  ;;  %1387 = vmatprep.subr.bf16.mxu1 %v1919_v25  ;;  %v2008_v24 = vld [vmem:[%s2680_s4 + $0x148] ss:$48 sps:$4 sm:$0xff]   ;;  %v2013_v25 = vld [vmem:[%s2680_s4 + $0xe4] ss:$48 sps:$4 sm:$0xff]  }
  0x5a   :  { %1345 = vmatpush1.bf16.msra.mxu0 %v1914_v26  ;;  %1388 = vmatpush1.bf16.msra.mxu1 %v1917_v27  ;;  %v2016_v26 = vld [vmem:[%s2680_s4 + $0xec] ss:$48 sps:$4 sm:$0xff]   ;;  %v2011_v27 = vld [vmem:[%s2680_s4 + $0xe0] ss:$48 sps:$4 sm:$0xff]  }
  0x5b   :  { %1346 = vmatprep.subr.bf16.mxu0 %v1922_v28  ;;  %1389 = vmatprep.subr.bf16.mxu1 %v1925_v29  ;;  %v2014_v28 = vld [vmem:[%s2680_s4 + $0xe8] ss:$48 sps:$4 sm:$0xff]   ;;  %v2019_v29 = vld [vmem:[%s2680_s4 + $0x84] ss:$48 sps:$4 sm:$0xff]  }
  0x5e   :  { %1347 = vmatpush1.bf16.msra.mxu0 %v1920_v30  ;;  %1390 = vmatpush1.bf16.msra.mxu1 %v1923_v31  ;;  %v2022_v30 = vld [vmem:[%s2680_s4 + $0x8c] ss:$48 sps:$4 sm:$0xff]   ;;  %v2017_v31 = vld [vmem:[%s2680_s4 + $0x80] ss:$48 sps:$4 sm:$0xff]  }
  0x5f   :  { %1348 = vmatprep.subr.bf16.mxu0 %v1928_v32  ;;  %1391 = vmatprep.subr.bf16.mxu1 %v1931_v33  ;;  %v2020_v32 = vld [vmem:[%s2680_s4 + $0x88] ss:$48 sps:$4 sm:$0xff]   ;;  %v2025_v33 = vld [vmem:[%s2680_s4 + $0x24] ss:$48 sps:$4 sm:$0xff]  }
  0x62   :  { %1349 = vmatpush1.bf16.msra.mxu0 %v1926_v34  ;;  %1392 = vmatpush1.bf16.msra.mxu1 %v1929_v35  ;;  %v2028_v34 = vld [vmem:[%s2680_s4 + $0x2c] ss:$48 sps:$4 sm:$0xff]   ;;  %v2023_v35 = vld [vmem:[%s2680_s4 + $0x20] ss:$48 sps:$4 sm:$0xff]  }
  0x63   :  { %1420 = vmatprep.subr.bf16.mxu0 %v1935_v36  ;;  %1463 = vmatprep.subr.bf16.mxu1 %v1938_v37  ;;  %v2026_v36 = vld [vmem:[%s2680_s4 + $0x28] ss:$48 sps:$4 sm:$0xff]   ;;  %v92_v37 = vlaneseq }
  0x65   :  { %1367 = vmatmul.mubr.bf16.vlgmr.msra.gmra.mxu0 %v2377_v38  ;;  %1410 = vmatmul.mubr.bf16.vlgmr.msra.gmra.mxu1 %v2377_v38 }
  0x66   :  { %1421 = vmatpush1.bf16.msra.mxu0 %v1933_v39  ;;  %1464 = vmatpush1.bf16.msra.mxu1 %v1936_v40  ;;  %v2575_v39 = vshrl.u32 %v92_v37, 7 }
  0x67   :  { %1422 = vmatprep.subr.bf16.mxu0 %v1941_v41  ;;  %1465 = vmatprep.subr.bf16.mxu1 %v1944_v42  ;;  %v90_v41 = vld [vmem:[%s2682_s3] sm:$0xff] }
  0x68   :  { %1452 = vmatprep.mubr.bf16.mxu0 %v2029_v3  ;;  %1495 = vmatprep.mubr.bf16.mxu1 %v2029_v3  ;;  %v2578_v40 = vsub.s32 0, %v2575_v39  ;;  %v2584_v42 = vsub.s32 2, %v2575_v39 }
  0x6a   :  { %1423 = vmatpush1.bf16.msra.mxu0 %v1939_v43  ;;  %1466 = vmatpush1.bf16.msra.mxu1 %v1942_v44  ;;  %v2587_v43 = vsub.s32 1, %v2575_v39  ;;  %v2590_v44 = vsub.s32 3, %v2575_v39 }
  0x6b   :  { %1424 = vmatprep.subr.bf16.mxu0 %v1947_v45  ;;  %1467 = vmatprep.subr.bf16.mxu1 %v1950_v46  ;;  %v103_v45 = vrot.slane %v90_v41, %v2584_v42 }
  0x6c   :  { %v99_v46 = vrot.slane %v90_v41, %v2587_v43 }
  0x6e   :  { %1425 = vmatpush1.bf16.msra.mxu0 %v1945_v47  ;;  %1468 = vmatpush1.bf16.msra.mxu1 %v1948_v48  ;;  %v107_v48 = vrot.slane %v90_v41, %v2590_v44 }
  0x6f   :  { %1426 = vmatprep.subr.bf16.mxu0 %v1953_v49  ;;  %1469 = vmatprep.subr.bf16.mxu1 %v1956_v50 }
  0x72   :  { %1427 = vmatpush1.bf16.msra.mxu0 %v1951_v51  ;;  %1470 = vmatpush1.bf16.msra.mxu1 %v1954_v52 }
  0x73   :  { %1428 = vmatprep.subr.bf16.mxu0 %v1959_v53  ;;  %1471 = vmatprep.subr.bf16.mxu1 %v1962_v54 }
  0x76   :  { %1429 = vmatpush1.bf16.msra.mxu0 %v1957_v55  ;;  %1472 = vmatpush1.bf16.msra.mxu1 %v1960_v56 }
  0x77   :  { %1430 = vmatprep.subr.bf16.mxu0 %v1965_v57  ;;  %1473 = vmatprep.subr.bf16.mxu1 %v1968_v58 }
  0x7a   :  { %1431 = vmatpush1.bf16.msra.mxu0 %v1963_v59  ;;  %1474 = vmatpush1.bf16.msra.mxu1 %v1966_v60 }
  0x7b   :  { %1432 = vmatprep.subr.bf16.mxu0 %v1971_v61  ;;  %1475 = vmatprep.subr.bf16.mxu1 %v1974_v62 }
  0x7e   :  { %1433 = vmatpush1.bf16.msra.mxu0 %v1969_v63  ;;  %1476 = vmatpush1.bf16.msra.mxu1 %v1972_v0 }
  0x7f   :  { %1434 = vmatprep.subr.bf16.mxu0 %v1977_v1  ;;  %1477 = vmatprep.subr.bf16.mxu1 %v1980_v2 }
  0x82   :  { %1435 = vmatpush1.bf16.msra.mxu0 %v1975_v4  ;;  %1478 = vmatpush1.bf16.msra.mxu1 %v1978_v5  ;;  %v110_v5 = vsub.s32 4, %v2575_v39 }
  0x83   :  { %1506 = vmatprep.subr.bf16.mxu0 %v1983_v7  ;;  %1549 = vmatprep.subr.bf16.mxu1 %v1986_v8  ;;  %v118_v7 = vsub.s32 6, %v2575_v39  ;;  %v114_v8 = vsub.s32 5, %v2575_v39 }
  0x85   :  { %1453 = vmatmul.mubr.bf16.vlgmr.msra.gmra.mxu0 %v2377_v38  ;;  %1496 = vmatmul.mubr.bf16.vlgmr.msra.gmra.mxu1 %v2377_v38 }
  0x86   :  { %1507 = vmatpush1.bf16.msra.mxu0 %v1981_v9  ;;  %1550 = vmatpush1.bf16.msra.mxu1 %v1984_v10  ;;  %v122_v9 = vsub.s32 7, %v2575_v39  ;;  %v111_v10 = vrot.slane %v90_v41, %v110_v5 }
  0x87   :  { %1508 = vmatprep.subr.bf16.mxu0 %v1989_v11  ;;  %1551 = vmatprep.subr.bf16.mxu1 %v1992_v12  ;;  %v119_v11 = vrot.slane %v90_v41, %v118_v7  ;;  %v115_v12 = vrot.slane %v90_v41, %v114_v8 }
  0x88   :  { %1538 = vmatprep.mubr.bf16.mxu0 %v2029_v3  ;;  %1581 = vmatprep.mubr.bf16.mxu1 %v2029_v3  ;;  %v2004_v3 = vld [vmem:[%s2680_s4 + $0x1ac] ss:$48 sps:$4 sm:$0xff]  }
  0x8a   :  { %1509 = vmatpush1.bf16.msra.mxu0 %v1987_v13  ;;  %1552 = vmatpush1.bf16.msra.mxu1 %v1990_v6  ;;  %v123_v6 = vrot.slane %v90_v41, %v122_v9 }
  0x8b   :  { %1510 = vmatprep.subr.bf16.mxu0 %v1995_v14  ;;  %1553 = vmatprep.subr.bf16.mxu1 %v1998_v15 }
  0x8e   :  { %1511 = vmatpush1.bf16.msra.mxu0 %v1993_v16  ;;  %1554 = vmatpush1.bf16.msra.mxu1 %v1996_v17 }
  0x8f   :  { %1512 = vmatprep.subr.bf16.mxu0 %v2001_v18  ;;  %1555 = vmatprep.subr.bf16.mxu1 %v2004_v3 }
  0x92   :  { %1513 = vmatpush1.bf16.msra.mxu0 %v1999_v19  ;;  %1556 = vmatpush1.bf16.msra.mxu1 %v2002_v20 }
  0x93   :  { %1514 = vmatprep.subr.bf16.mxu0 %v2007_v21  ;;  %1557 = vmatprep.subr.bf16.mxu1 %v2010_v22 }
  0x96   :  { %1515 = vmatpush1.bf16.msra.mxu0 %v2005_v23  ;;  %1558 = vmatpush1.bf16.msra.mxu1 %v2008_v24 }
  0x97   :  { %1516 = vmatprep.subr.bf16.mxu0 %v2013_v25  ;;  %1559 = vmatprep.subr.bf16.mxu1 %v2016_v26 }
  0x9a   :  { %1517 = vmatpush1.bf16.msra.mxu0 %v2011_v27  ;;  %1560 = vmatpush1.bf16.msra.mxu1 %v2014_v28 }
  0x9b   :  { %1518 = vmatprep.subr.bf16.mxu0 %v2019_v29  ;;  %1561 = vmatprep.subr.bf16.mxu1 %v2022_v30 }
  0x9e   :  { %1519 = vmatpush1.bf16.msra.mxu0 %v2017_v31  ;;  %1562 = vmatpush1.bf16.msra.mxu1 %v2020_v32  ;;  %v784_v32 = vld [vmem:[%s2684_s5] sm:$0xff] }
  0x9f   :  { %1520 = vmatprep.subr.bf16.mxu0 %v2025_v33  ;;  %1563 = vmatprep.subr.bf16.mxu1 %v2028_v34  ;;  %v791_v33 = vrot.slane %v784_v32, %v2578_v40  ;;  %v799_v34 = vrot.slane %v784_v32, %v2584_v42  ;;  %v803_v37 = vrot.slane %v784_v32, %v2590_v44 }
  0xa2   :  { %1521 = vmatpush1.bf16.msra.mxu0 %v2023_v35  ;;  %1564 = vmatpush1.bf16.msra.mxu1 %v2026_v36  ;;  %v795_v35 = vrot.slane %v784_v32, %v2587_v43 }
  0xa5   :  { %1539 = vmatmul.mubr.bf16.vlgmr.msra.gmra.mxu0 %v2377_v38  ;;  %1582 = vmatmul.mubr.bf16.vlgmr.msra.gmra.mxu1 %v2377_v38  ;;  %v95_v38 = vrot.slane %v90_v41, %v2578_v40 }
  0xe5   :  { %v492_v47 = vpop.f32.mrf.mxu0  ;;  %v535_v50 = vpop.f32.mrf.mxu1 }
  0xe6   :  { %v493_v49 = vadd.f32 %v492_v47, %v95_v38  ;;  %v536_v51 = vadd.f32 %v535_v50, %v103_v45 }
  0xe7   :  { %v494_v52 = vpop.f32.mrf.mxu0  ;;  %v537_v54 = vpop.f32.mrf.mxu1 }
  0xe8   :  { %v495_v53 = vadd.f32 %v494_v52, %v99_v46  ;;  %v538_v55 = vadd.f32 %v537_v54, %v107_v48 }
  0xe9   :  { %v496_v56 = vpop.f32.mrf.mxu0  ;;  %v539_v58 = vpop.f32.mrf.mxu1 }
  0xea   :  { %v1862_v57 = vpack.c.bf16 %v495_v53, %v493_v49  ;;  %v1863_v59 = vpack.c.bf16 %v538_v55, %v536_v51  ;;  %v497_v61 = vadd.f32 %v496_v56, %v95_v38  ;;  %v540_v0 = vadd.f32 %v539_v58, %v103_v45 }
  0xeb   :  { %v498_v60 = vpop.f32.mrf.mxu0  ;;  %v541_v63 = vpop.f32.mrf.mxu1 }
  0xec   :  { %678 = vst [vmem:[%s2683_s6] sm:$0xff] %v1862_v57  ;;  %v499_v62 = vadd.f32 %v498_v60, %v99_v46  ;;  %679 = vst [vmem:[%s2683_s6 + $0x8] sm:$0xff] %v1863_v59  ;;  %v542_v1 = vadd.f32 %v541_v63, %v107_v48  ;;  %v815_v63 = vrot.slane %v784_v32, %v118_v7 }
  0xee   :  { %v1866_v2 = vpack.c.bf16 %v499_v62, %v497_v61  ;;  %v1867_v4 = vpack.c.bf16 %v542_v1, %v540_v0  ;;  %v807_v62 = vrot.slane %v784_v32, %v110_v5  ;;  %v811_v0 = vrot.slane %v784_v32, %v114_v8 }
  0xf0   :  { %682 = vst [vmem:[%s2683_s6 + $0x50] sm:$0xff] %v1866_v2  ;;  %683 = vst [vmem:[%s2683_s6 + $0x58] sm:$0xff] %v1867_v4  ;;  %v819_v2 = vrot.slane %v784_v32, %v122_v9 }
 0x105   :  { %v578_v13 = vpop.f32.mrf.mxu0  ;;  %v621_v15 = vpop.f32.mrf.mxu1 }
 0x106   :  { %v579_v14 = vadd.f32 %v578_v13, %v111_v10  ;;  %v622_v16 = vadd.f32 %v621_v15, %v119_v11 }
 0x107   :  { %v580_v17 = vpop.f32.mrf.mxu0  ;;  %v623_v3 = vpop.f32.mrf.mxu1 }
 0x108   :  { %v581_v18 = vadd.f32 %v580_v17, %v115_v12  ;;  %v624_v19 = vadd.f32 %v623_v3, %v123_v6 }
 0x109   :  { %v582_v20 = vpop.f32.mrf.mxu0  ;;  %v625_v22 = vpop.f32.mrf.mxu1 }
 0x10a   :  { %v1864_v21 = vpack.c.bf16 %v581_v18, %v579_v14  ;;  %v1865_v23 = vpack.c.bf16 %v624_v19, %v622_v16  ;;  %v583_v25 = vadd.f32 %v582_v20, %v111_v10  ;;  %v626_v28 = vadd.f32 %v625_v22, %v119_v11 }
 0x10b   :  { %v584_v24 = vpop.f32.mrf.mxu0  ;;  %v627_v27 = vpop.f32.mrf.mxu1 }
 0x10c   :  { %680 = vst [vmem:[%s2683_s6 + $0x10] sm:$0xff] %v1864_v21  ;;  %v585_v26 = vadd.f32 %v584_v24, %v115_v12  ;;  %681 = vst [vmem:[%s2683_s6 + $0x18] sm:$0xff] %v1865_v23  ;;  %v628_v29 = vadd.f32 %v627_v27, %v123_v6  ;;  %v785_v21 = vld [vmem:[%s2684_s5 + $0x8] sm:$0xf] }
 0x10d   :  { %v823_v22 = vrot.slane %v785_v21, %v2578_v40  ;;  %v827_v23 = vrot.slane %v785_v21, %v2587_v43 }
 0x10e   :  { %v1868_v30 = vpack.c.bf16 %v585_v26, %v583_v25  ;;  %v1869_v31 = vpack.c.bf16 %v628_v29, %v626_v28  ;;  %v831_v25 = vrot.slane %v785_v21, %v2584_v42  ;;  %v835_v26 = vrot.slane %v785_v21, %v2590_v44 }
 0x110   :  { %684 = vst [vmem:[%s2683_s6 + $0x60] sm:$0xff] %v1868_v30  ;;  %685 = vst [vmem:[%s2683_s6 + $0x68] sm:$0xff] %v1869_v31 }
 0x125   :  { %v1368_v36 = vpop.f32.mrf.mxu0  ;;  %v1411_v38 = vpop.f32.mrf.mxu1 }
 0x126   :  { %v1369_v41 = vadd.f32 %v1368_v36, %v791_v33  ;;  %v1412_v45 = vadd.f32 %v1411_v38, %v799_v34 }
 0x127   :  { %v1370_v46 = vpop.f32.mrf.mxu0  ;;  %v1413_v48 = vpop.f32.mrf.mxu1 }
 0x128   :  { %v1371_v47 = vadd.f32 %v1370_v46, %v795_v35  ;;  %v1414_v49 = vadd.f32 %v1413_v48, %v803_v37 }
 0x129   :  { %v1372_v50 = vpop.f32.mrf.mxu0  ;;  %v1415_v52 = vpop.f32.mrf.mxu1 }
 0x12a   :  { %v1870_v51 = vpack.c.bf16 %v1371_v47, %v1369_v41  ;;  %v1871_v53 = vpack.c.bf16 %v1414_v49, %v1412_v45  ;;  %v1373_v55 = vadd.f32 %v1372_v50, %v791_v33  ;;  %v1416_v58 = vadd.f32 %v1415_v52, %v799_v34 }
 0x12b   :  { %v1374_v54 = vpop.f32.mrf.mxu0  ;;  %v1417_v57 = vpop.f32.mrf.mxu1 }
 0x12c   :  { %1664 = vst [vmem:[%s2683_s6 + $0x20] sm:$0xff] %v1870_v51  ;;  %v1375_v56 = vadd.f32 %v1374_v54, %v795_v35  ;;  %1665 = vst [vmem:[%s2683_s6 + $0x28] sm:$0xff] %v1871_v53  ;;  %v1418_v59 = vadd.f32 %v1417_v57, %v803_v37 }
 0x12e   :  { %v1876_v60 = vpack.c.bf16 %v1375_v56, %v1373_v55  ;;  %v1877_v61 = vpack.c.bf16 %v1418_v59, %v1416_v58 }
 0x130   :  { %1670 = vst [vmem:[%s2683_s6 + $0x70] sm:$0xff] %v1876_v60  ;;  %1671 = vst [vmem:[%s2683_s6 + $0x78] sm:$0xff] %v1877_v61 }
 0x145   :  { %v1454_v1 = vpop.f32.mrf.mxu0  ;;  %v1497_v10 = vpop.f32.mrf.mxu1 }
 0x146   :  { %v1455_v4 = vadd.f32 %v1454_v1, %v807_v62  ;;  %v1498_v11 = vadd.f32 %v1497_v10, %v815_v63 }
 0x147   :  { %v1456_v12 = vpop.f32.mrf.mxu0  ;;  %v1499_v6 = vpop.f32.mrf.mxu1 }
 0x148   :  { %v1457_v13 = vadd.f32 %v1456_v12, %v811_v0  ;;  %v1500_v14 = vadd.f32 %v1499_v6, %v819_v2 }
 0x149   :  { %v1458_v15 = vpop.f32.mrf.mxu0  ;;  %v1501_v17 = vpop.f32.mrf.mxu1 }
 0x14a   :  { %v1872_v16 = vpack.c.bf16 %v1457_v13, %v1455_v4  ;;  %v1873_v18 = vpack.c.bf16 %v1500_v14, %v1498_v11  ;;  %v1459_v5 = vadd.f32 %v1458_v15, %v807_v62  ;;  %v1502_v8 = vadd.f32 %v1501_v17, %v815_v63 }
 0x14b   :  { %v1460_v3 = vpop.f32.mrf.mxu0  ;;  %v1503_v39 = vpop.f32.mrf.mxu1 }
 0x14c   :  { %1666 = vst [vmem:[%s2683_s6 + $0x30] sm:$0xff] %v1872_v16  ;;  %v1461_v7 = vadd.f32 %v1460_v3, %v811_v0  ;;  %1667 = vst [vmem:[%s2683_s6 + $0x38] sm:$0xff] %v1873_v18  ;;  %v1504_v9 = vadd.f32 %v1503_v39, %v819_v2 }
 0x14e   :  { %v1878_v19 = vpack.c.bf16 %v1461_v7, %v1459_v5  ;;  %v1879_v20 = vpack.c.bf16 %v1504_v9, %v1502_v8 }
 0x150   :  { %1672 = vst [vmem:[%s2683_s6 + $0x80] sm:$0xff] %v1878_v19  ;;  %1673 = vst [vmem:[%s2683_s6 + $0x88] sm:$0xff] %v1879_v20 }
 0x165   :  { %v1540_v24 = vpop.f32.mrf.mxu0  ;;  %v1583_v27 = vpop.f32.mrf.mxu1 }
 0x166   :  { %v1541_v29 = vadd.f32 %v1540_v24, %v823_v22  ;;  %v1584_v32 = vadd.f32 %v1583_v27, %v831_v25 }
 0x167   :  { %v1542_v28 = vpop.f32.mrf.mxu0  ;;  %v1585_v31 = vpop.f32.mrf.mxu1 }
 0x168   :  { %v1543_v30 = vadd.f32 %v1542_v28, %v827_v23  ;;  %v1586_v33 = vadd.f32 %v1585_v31, %v835_v26 }
 0x169   :  { %v1544_v34 = vpop.f32.mrf.mxu0  ;;  %v1587_v36 = vpop.f32.mrf.mxu1 }
 0x16a   :  { %v1874_v35 = vpack.c.bf16 %v1543_v30, %v1541_v29  ;;  %v1875_v37 = vpack.c.bf16 %v1586_v33, %v1584_v32  ;;  %v1545_v40 = vadd.f32 %v1544_v34, %v823_v22  ;;  %v1588_v44 = vadd.f32 %v1587_v36, %v831_v25 }
 0x16b   :  { %v1546_v41 = vpop.f32.mrf.mxu0  ;;  %v1589_v43 = vpop.f32.mrf.mxu1 }
 0x16c   :  { %1668 = vst [vmem:[%s2683_s6 + $0x40] sm:$0xff] %v1874_v35  ;;  %v1547_v42 = vadd.f32 %v1546_v41, %v827_v23  ;;  %1669 = vst [vmem:[%s2683_s6 + $0x48] sm:$0xff] %v1875_v37  ;;  %v1590_v38 = vadd.f32 %v1589_v43, %v835_v26 }
 0x16e   :  { %v1880_v45 = vpack.c.bf16 %v1547_v42, %v1545_v40  ;;  %v1881_v46 = vpack.c.bf16 %v1590_v38, %v1588_v44 }
 0x170   :  { %1674 = vst [vmem:[%s2683_s6 + $0x90] sm:$0xff] %v1880_v45  ;;  %1675 = vst [vmem:[%s2683_s6 + $0x98] sm:$0xff] %v1881_v46 }

// kernel: simple_baseline_net.3
= control target key start
LH: loop header
LB: loop body
LE: loop exit
PB: predicated region body
PF: predicated region fallthrough
CT: control target
= control target key end

     0   :  { %s2998_s1 = inlined_call_operand.vmem [shape: bf16[2560,128], index: 1, kind: input, shape index: {}]   ;;  %s2999_s0 = inlined_call_operand.vmem [shape: bf16[16,2560], index: 0, kind: input, shape index: {}]   ;;  %s3000_s2 = inlined_call_operand.vmem [shape: f32[1,128], index: 2, kind: input, shape index: {}]   ;;  %s3001_s3 = inlined_call_operand.vmem [shape: f32[16,128], index: 3, kind: output, shape index: {}]  }
   0x1   :  { %v2239_v0 = vld [vmem:[%s2998_s1 + $0x78] sm:$0xff]   ;;  %v2243_v4 = vld [vmem:[%s2998_s1 + $0x70] sm:$0xff]   ;;  %v2247_v8 = vld [vmem:[%s2998_s1 + $0x68] sm:$0xff]  }
   0x2   :  { %v2240_v1 = vld [vmem:[%s2998_s1 + $0xf8] sm:$0xff]   ;;  %2019 = vmatprep.subr.bf16.mxu0 %v2239_v0  ;;  %v2244_v5 = vld [vmem:[%s2998_s1 + $0xf0] sm:$0xff]   ;;  %v2248_v9 = vld [vmem:[%s2998_s1 + $0xe8] sm:$0xff]  }
   0x3   :  { %v2241_v2 = vld [vmem:[%s2998_s1 + $0x38] sm:$0xff]   ;;  %2041 = vmatprep.subr.bf16.mxu1 %v2240_v1  ;;  %v2245_v6 = vld [vmem:[%s2998_s1 + $0x30] sm:$0xff]   ;;  %v2249_v10 = vld [vmem:[%s2998_s1 + $0x28] sm:$0xff]  }
   0x4   :  { %v2242_v3 = vld [vmem:[%s2998_s1 + $0xb8] sm:$0xff]   ;;  %2020 = vmatpush3.bf16.msra.mxu0 %v2241_v2  ;;  %v2246_v7 = vld [vmem:[%s2998_s1 + $0xb0] sm:$0xff]   ;;  %v2250_v11 = vld [vmem:[%s2998_s1 + $0xa8] sm:$0xff]  }
   0x5   :  { %2042 = vmatpush3.bf16.msra.mxu1 %v2242_v3  ;;  %2021 = vmatprep.subr.bf16.mxu0 %v2243_v4  ;;  %v2251_v12 = vld [vmem:[%s2998_s1 + $0x60] sm:$0xff]   ;;  %v2255_v16 = vld [vmem:[%s2998_s1 + $0x58] sm:$0xff]   ;;  %v2259_v20 = vld [vmem:[%s2998_s1 + $0x50] sm:$0xff]  }
   0x6   :  { %2043 = vmatprep.subr.bf16.mxu1 %v2244_v5  ;;  %v2252_v13 = vld [vmem:[%s2998_s1 + $0xe0] sm:$0xff]   ;;  %v2256_v17 = vld [vmem:[%s2998_s1 + $0xd8] sm:$0xff]   ;;  %v2260_v21 = vld [vmem:[%s2998_s1 + $0xd0] sm:$0xff]  }
   0x7   :  { %v2253_v14 = vld [vmem:[%s2998_s1 + $0x20] sm:$0xff]   ;;  %v2257_v18 = vld [vmem:[%s2998_s1 + $0x18] sm:$0xff]   ;;  %v2261_v22 = vld [vmem:[%s2998_s1 + $0x10] sm:$0xff]  }
   0x8   :  { %2022 = vmatpush3.bf16.msra.mxu0 %v2245_v6  ;;  %v2254_v15 = vld [vmem:[%s2998_s1 + $0xa0] sm:$0xff]   ;;  %v2258_v19 = vld [vmem:[%s2998_s1 + $0x98] sm:$0xff]   ;;  %v2262_v23 = vld [vmem:[%s2998_s1 + $0x90] sm:$0xff]  }
   0x9   :  { %2044 = vmatpush3.bf16.msra.mxu1 %v2246_v7  ;;  %2023 = vmatprep.subr.bf16.mxu0 %v2247_v8  ;;  %v2263_v24 = vld [vmem:[%s2998_s1 + $0x48] sm:$0xff]   ;;  %v2267_v28 = vld [vmem:[%s2998_s1 + $0x40] sm:$0xff]   ;;  %v2277_v36 = vld [vmem:[%s2998_s1 + $0x178] sm:$0xff]  }
   0xa   :  { %2045 = vmatprep.subr.bf16.mxu1 %v2248_v9  ;;  %v2264_v25 = vld [vmem:[%s2998_s1 + $0xc8] sm:$0xff]   ;;  %v2268_v29 = vld [vmem:[%s2998_s1 + $0xc0] sm:$0xff]   ;;  %v2278_v37 = vld [vmem:[%s2998_s1 + $0x1f8] sm:$0xff]  }
   0xb   :  { %v2265_v26 = vld [vmem:[%s2998_s1 + $0x8] sm:$0xff]   ;;  %v2269_v30 = vld [vmem:[%s2998_s1] sm:$0xff]   ;;  %v2279_v38 = vld [vmem:[%s2998_s1 + $0x138] sm:$0xff]  }
   0xc   :  { %2024 = vmatpush3.bf16.msra.mxu0 %v2249_v10  ;;  %v2266_v27 = vld [vmem:[%s2998_s1 + $0x88] sm:$0xff]   ;;  %v2270_v31 = vld [vmem:[%s2998_s1 + $0x80] sm:$0xff]   ;;  %v2280_v39 = vld [vmem:[%s2998_s1 + $0x1b8] sm:$0xff]  }
   0xd   :  { %2046 = vmatpush3.bf16.msra.mxu1 %v2250_v11  ;;  %2025 = vmatprep.subr.bf16.mxu0 %v2251_v12  ;;  %v2271_v32 = vld [vmem:[%s2999_s0] ss:$80 sps:$4 sm:$0xff]   ;;  %v2273_v33 = vld [vmem:[%s2999_s0 + $0x4] ss:$80 sps:$4 sm:$0xff]   ;;  %v2274_v34 = vld [vmem:[%s2999_s0 + $0x8] ss:$80 sps:$4 sm:$0xff]  }
   0xe   :  { %2047 = vmatprep.subr.bf16.mxu1 %v2252_v13  ;;  %v2276_v35 = vld [vmem:[%s2999_s0 + $0xc] ss:$80 sps:$4 sm:$0xff]   ;;  %1454 = vmatprep.mubr.bf16.mxu0 %v2273_v33  ;;  %v2281_v40 = vld [vmem:[%s2998_s1 + $0x170] sm:$0xff]   ;;  %v2289_v48 = vld [vmem:[%s2998_s1 + $0x160] sm:$0xff]  }
   0xf   :  { %1495 = vmatprep.mubr.bf16.mxu1 %v2276_v35  ;;  %v2282_v41 = vld [vmem:[%s2998_s1 + $0x1f0] sm:$0xff]   ;;  %v2285_v44 = vld [vmem:[%s2998_s1 + $0x168] sm:$0xff]   ;;  %v2290_v49 = vld [vmem:[%s2998_s1 + $0x1e0] sm:$0xff]  }
  0x10   :  { %2026 = vmatpush3.bf16.msra.mxu0 %v2253_v14  ;;  %v2283_v42 = vld [vmem:[%s2998_s1 + $0x130] sm:$0xff]   ;;  %v2286_v45 = vld [vmem:[%s2998_s1 + $0x1e8] sm:$0xff]   ;;  %v2291_v50 = vld [vmem:[%s2998_s1 + $0x120] sm:$0xff]  }
  0x11   :  { %2048 = vmatpush3.bf16.msra.mxu1 %v2254_v15  ;;  %2027 = vmatprep.subr.bf16.mxu0 %v2255_v16  ;;  %v2284_v43 = vld [vmem:[%s2998_s1 + $0x1b0] sm:$0xff]   ;;  %v2287_v46 = vld [vmem:[%s2998_s1 + $0x128] sm:$0xff]   ;;  %v2292_v51 = vld [vmem:[%s2998_s1 + $0x1a0] sm:$0xff]  }
  0x12   :  { %2049 = vmatprep.subr.bf16.mxu1 %v2256_v17  ;;  %v2288_v47 = vld [vmem:[%s2998_s1 + $0x1a8] sm:$0xff]   ;;  %v2293_v52 = vld [vmem:[%s2998_s1 + $0x158] sm:$0xff]   ;;  %v2297_v56 = vld [vmem:[%s2998_s1 + $0x150] sm:$0xff]  }
  0x13   :  { %v2294_v53 = vld [vmem:[%s2998_s1 + $0x1d8] sm:$0xff]   ;;  %v2298_v57 = vld [vmem:[%s2998_s1 + $0x1d0] sm:$0xff]   ;;  %v2301_v60 = vld [vmem:[%s2998_s1 + $0x148] sm:$0xff]  }
  0x14   :  { %2028 = vmatpush3.bf16.msra.mxu0 %v2257_v18  ;;  %v2295_v54 = vld [vmem:[%s2998_s1 + $0x118] sm:$0xff]   ;;  %v2299_v58 = vld [vmem:[%s2998_s1 + $0x110] sm:$0xff]   ;;  %v2302_v61 = vld [vmem:[%s2998_s1 + $0x1c8] sm:$0xff]  }
  0x15   :  { %2050 = vmatpush3.bf16.msra.mxu1 %v2258_v19  ;;  %2029 = vmatprep.subr.bf16.mxu0 %v2259_v20  ;;  %v2296_v55 = vld [vmem:[%s2998_s1 + $0x198] sm:$0xff]   ;;  %v2300_v59 = vld [vmem:[%s2998_s1 + $0x190] sm:$0xff]   ;;  %v2303_v62 = vld [vmem:[%s2998_s1 + $0x108] sm:$0xff]  }
  0x16   :  { %2051 = vmatprep.subr.bf16.mxu1 %v2260_v21  ;;  %v2304_v63 = vld [vmem:[%s2998_s1 + $0x188] sm:$0xff]   ;;  %v2305_v0 = vld [vmem:[%s2998_s1 + $0x140] sm:$0xff]   ;;  %v2315_v8 = vld [vmem:[%s2998_s1 + $0x278] sm:$0xff]  }
  0x17   :  { %v2306_v1 = vld [vmem:[%s2998_s1 + $0x1c0] sm:$0xff]   ;;  %v2312_v6 = vld [vmem:[%s2999_s0 + $0x18] ss:$80 sps:$4 sm:$0xff]   ;;  %v2314_v7 = vld [vmem:[%s2999_s0 + $0x1c] ss:$80 sps:$4 sm:$0xff]  }
  0x18   :  { %2030 = vmatpush3.bf16.msra.mxu0 %v2261_v22  ;;  %v2307_v2 = vld [vmem:[%s2998_s1 + $0x100] sm:$0xff]   ;;  %v2316_v9 = vld [vmem:[%s2998_s1 + $0x2f8] sm:$0xff]   ;;  %v2319_v12 = vld [vmem:[%s2998_s1 + $0x270] sm:$0xff]  }
  0x19   :  { %2052 = vmatpush3.bf16.msra.mxu1 %v2262_v23  ;;  %2031 = vmatprep.subr.bf16.mxu0 %v2263_v24  ;;  %v2308_v3 = vld [vmem:[%s2998_s1 + $0x180] sm:$0xff]   ;;  %v2317_v10 = vld [vmem:[%s2998_s1 + $0x238] sm:$0xff]   ;;  %v2320_v13 = vld [vmem:[%s2998_s1 + $0x2f0] sm:$0xff]  }
  0x1a   :  { %2053 = vmatprep.subr.bf16.mxu1 %v2264_v25  ;;  %v2309_v4 = vld [vmem:[%s2999_s0 + $0x10] ss:$80 sps:$4 sm:$0xff]   ;;  %v2311_v5 = vld [vmem:[%s2999_s0 + $0x14] ss:$80 sps:$4 sm:$0xff]   ;;  %v2318_v11 = vld [vmem:[%s2998_s1 + $0x2b8] sm:$0xff]  }
  0x1b   :  { %v2321_v14 = vld [vmem:[%s2998_s1 + $0x230] sm:$0xff]   ;;  %v2323_v16 = vld [vmem:[%s2998_s1 + $0x268] sm:$0xff]   ;;  %v2327_v20 = vld [vmem:[%s2998_s1 + $0x260] sm:$0xff]  }
  0x1c   :  { %2032 = vmatpush3.bf16.msra.mxu0 %v2265_v26  ;;  %v2322_v15 = vld [vmem:[%s2998_s1 + $0x2b0] sm:$0xff]   ;;  %v2324_v17 = vld [vmem:[%s2998_s1 + $0x2e8] sm:$0xff]   ;;  %v2328_v21 = vld [vmem:[%s2998_s1 + $0x2e0] sm:$0xff]  }
  0x1d   :  { %2054 = vmatpush3.bf16.msra.mxu1 %v2266_v27  ;;  %2033 = vmatprep.subr.bf16.mxu0 %v2267_v28  ;;  %v2325_v18 = vld [vmem:[%s2998_s1 + $0x228] sm:$0xff]   ;;  %v2329_v22 = vld [vmem:[%s2998_s1 + $0x220] sm:$0xff]   ;;  %v2331_v24 = vld [vmem:[%s2998_s1 + $0x258] sm:$0xff]  }
  0x1e   :  { %2055 = vmatprep.subr.bf16.mxu1 %v2268_v29  ;;  %v2326_v19 = vld [vmem:[%s2998_s1 + $0x2a8] sm:$0xff]   ;;  %v2330_v23 = vld [vmem:[%s2998_s1 + $0x2a0] sm:$0xff]   ;;  %v2332_v25 = vld [vmem:[%s2998_s1 + $0x2d8] sm:$0xff]  }
  0x1f   :  { %v2333_v26 = vld [vmem:[%s2998_s1 + $0x218] sm:$0xff]   ;;  %v2335_v28 = vld [vmem:[%s2998_s1 + $0x250] sm:$0xff]   ;;  %v2340_v33 = vld [vmem:[%s2998_s1 + $0x2c8] sm:$0xff]  }
  0x20   :  { %2034 = vmatpush3.bf16.msra.mxu0 %v2269_v30  ;;  %v2334_v27 = vld [vmem:[%s2998_s1 + $0x298] sm:$0xff]   ;;  %v2336_v29 = vld [vmem:[%s2998_s1 + $0x2d0] sm:$0xff]   ;;  %v2342_v35 = vld [vmem:[%s2998_s1 + $0x288] sm:$0xff]  }
  0x21   :  { %2056 = vmatpush3.bf16.msra.mxu1 %v2270_v31  ;;  %2063 = vmatprep.subr.bf16.mxu0 %v2277_v36  ;;  %v2337_v30 = vld [vmem:[%s2998_s1 + $0x210] sm:$0xff]   ;;  %v2343_v36 = vld [vmem:[%s2998_s1 + $0x240] sm:$0xff]  }
  0x22   :  { %2085 = vmatprep.subr.bf16.mxu1 %v2278_v37  ;;  %v2338_v31 = vld [vmem:[%s2998_s1 + $0x290] sm:$0xff]   ;;  %v2344_v37 = vld [vmem:[%s2998_s1 + $0x2c0] sm:$0xff]  }
  0x23   :  { %1455 = vmatmul.mubr.bf16.vlgmr.msra.gmra.mxu0 %v2271_v32  ;;  %v2339_v32 = vld [vmem:[%s2998_s1 + $0x248] sm:$0xff]  }
  0x24   :  { %1496 = vmatmul.mubr.bf16.vlgmr.msra.gmra.mxu1 %v2274_v34  ;;  %2064 = vmatpush3.bf16.msra.mxu0 %v2279_v38  ;;  %v2341_v34 = vld [vmem:[%s2998_s1 + $0x208] sm:$0xff]   ;;  %v2345_v38 = vld [vmem:[%s2998_s1 + $0x200] sm:$0xff]  }
  0x25   :  { %2086 = vmatpush3.bf16.msra.mxu1 %v2280_v39  ;;  %2065 = vmatprep.subr.bf16.mxu0 %v2281_v40  ;;  %v2346_v39 = vld [vmem:[%s2998_s1 + $0x280] sm:$0xff]  }
  0x26   :  { %2087 = vmatprep.subr.bf16.mxu1 %v2282_v41  ;;  %1536 = vmatprep.mubr.bf16.mxu0 %v2311_v5  ;;  %v2347_v40 = vld [vmem:[%s2999_s0 + $0x20] ss:$80 sps:$4 sm:$0xff]   ;;  %v2349_v41 = vld [vmem:[%s2999_s0 + $0x24] ss:$80 sps:$4 sm:$0xff]   ;;  %v2378_v5 = vld [vmem:[%s2998_s1 + $0x3c8] sm:$0xff]  }
  0x27   :  { %1577 = vmatprep.mubr.bf16.mxu1 %v2314_v7  ;;  %v2380_v7 = vld [vmem:[%s2998_s1 + $0x388] sm:$0xff]  }
  0x28   :  { %2066 = vmatpush3.bf16.msra.mxu0 %v2283_v42  ;;  %v2350_v42 = vld [vmem:[%s2999_s0 + $0x28] ss:$80 sps:$4 sm:$0xff]  }
  0x29   :  { %2088 = vmatpush3.bf16.msra.mxu1 %v2284_v43  ;;  %2067 = vmatprep.subr.bf16.mxu0 %v2285_v44  ;;  %v2352_v43 = vld [vmem:[%s2999_s0 + $0x2c] ss:$80 sps:$4 sm:$0xff]  }
  0x2a   :  { %2089 = vmatprep.subr.bf16.mxu1 %v2286_v45  ;;  %v2353_v44 = vld [vmem:[%s2998_s1 + $0x378] sm:$0xff]  }
  0x2b   :  { %v2354_v45 = vld [vmem:[%s2998_s1 + $0x3f8] sm:$0xff]  }
  0x2c   :  { %2068 = vmatpush3.bf16.msra.mxu0 %v2287_v46  ;;  %v2355_v46 = vld [vmem:[%s2998_s1 + $0x338] sm:$0xff]  }
  0x2d   :  { %2090 = vmatpush3.bf16.msra.mxu1 %v2288_v47  ;;  %2069 = vmatprep.subr.bf16.mxu0 %v2289_v48  ;;  %v2356_v47 = vld [vmem:[%s2998_s1 + $0x3b8] sm:$0xff]   ;;  %v2357_v48 = vld [vmem:[%s2998_s1 + $0x370] sm:$0xff]  }
  0x2e   :  { %2091 = vmatprep.subr.bf16.mxu1 %v2290_v49  ;;  %v2358_v49 = vld [vmem:[%s2998_s1 + $0x3f0] sm:$0xff]  }
  0x30   :  { %2070 = vmatpush3.bf16.msra.mxu0 %v2291_v50  ;;  %v2359_v50 = vld [vmem:[%s2998_s1 + $0x330] sm:$0xff]  }
  0x31   :  { %2092 = vmatpush3.bf16.msra.mxu1 %v2292_v51  ;;  %2071 = vmatprep.subr.bf16.mxu0 %v2293_v52  ;;  %v2360_v51 = vld [vmem:[%s2998_s1 + $0x3b0] sm:$0xff]   ;;  %v2361_v52 = vld [vmem:[%s2998_s1 + $0x368] sm:$0xff]  }
  0x32   :  { %2093 = vmatprep.subr.bf16.mxu1 %v2294_v53  ;;  %v2362_v53 = vld [vmem:[%s2998_s1 + $0x3e8] sm:$0xff]  }
  0x34   :  { %2072 = vmatpush3.bf16.msra.mxu0 %v2295_v54  ;;  %v2363_v54 = vld [vmem:[%s2998_s1 + $0x328] sm:$0xff]  }
  0x35   :  { %2094 = vmatpush3.bf16.msra.mxu1 %v2296_v55  ;;  %2073 = vmatprep.subr.bf16.mxu0 %v2297_v56  ;;  %v2364_v55 = vld [vmem:[%s2998_s1 + $0x3a8] sm:$0xff]   ;;  %v2365_v56 = vld [vmem:[%s2998_s1 + $0x360] sm:$0xff]  }
  0x36   :  { %2095 = vmatprep.subr.bf16.mxu1 %v2298_v57  ;;  %v2366_v57 = vld [vmem:[%s2998_s1 + $0x3e0] sm:$0xff]  }
  0x38   :  { %2074 = vmatpush3.bf16.msra.mxu0 %v2299_v58  ;;  %v2367_v58 = vld [vmem:[%s2998_s1 + $0x320] sm:$0xff]  }
  0x39   :  { %2096 = vmatpush3.bf16.msra.mxu1 %v2300_v59  ;;  %2075 = vmatprep.subr.bf16.mxu0 %v2301_v60  ;;  %v2368_v59 = vld [vmem:[%s2998_s1 + $0x3a0] sm:$0xff]   ;;  %v2369_v60 = vld [vmem:[%s2998_s1 + $0x358] sm:$0xff]  }
  0x3a   :  { %2097 = vmatprep.subr.bf16.mxu1 %v2302_v61  ;;  %v2370_v61 = vld [vmem:[%s2998_s1 + $0x3d8] sm:$0xff]  }
  0x3c   :  { %2076 = vmatpush3.bf16.msra.mxu0 %v2303_v62  ;;  %v2371_v62 = vld [vmem:[%s2998_s1 + $0x318] sm:$0xff]  }
  0x3d   :  { %2098 = vmatpush3.bf16.msra.mxu1 %v2304_v63  ;;  %2077 = vmatprep.subr.bf16.mxu0 %v2305_v0  ;;  %v2372_v63 = vld [vmem:[%s2998_s1 + $0x398] sm:$0xff]   ;;  %v2373_v0 = vld [vmem:[%s2998_s1 + $0x350] sm:$0xff]  }
  0x3e   :  { %2099 = vmatprep.subr.bf16.mxu1 %v2306_v1  ;;  %v2374_v1 = vld [vmem:[%s2998_s1 + $0x3d0] sm:$0xff]  }
  0x40   :  { %2078 = vmatpush3.bf16.msra.mxu0 %v2307_v2  ;;  %v2375_v2 = vld [vmem:[%s2998_s1 + $0x310] sm:$0xff]  }
  0x41   :  { %2100 = vmatpush3.bf16.msra.mxu1 %v2308_v3  ;;  %2107 = vmatprep.subr.bf16.mxu0 %v2315_v8  ;;  %v2376_v3 = vld [vmem:[%s2998_s1 + $0x390] sm:$0xff]   ;;  %v2381_v8 = vld [vmem:[%s2998_s1 + $0x340] sm:$0xff]  }
  0x42   :  { %2129 = vmatprep.subr.bf16.mxu1 %v2316_v9  ;;  %v2382_v9 = vld [vmem:[%s2998_s1 + $0x3c0] sm:$0xff]  }
  0x43   :  { %1537 = vmatmul.mubr.bf16.vlgmr.msra.gmra.mxu0 %v2309_v4  ;;  %v2377_v4 = vld [vmem:[%s2998_s1 + $0x348] sm:$0xff]  }
  0x44   :  { %1578 = vmatmul.mubr.bf16.vlgmr.msra.gmra.mxu1 %v2312_v6  ;;  %2108 = vmatpush3.bf16.msra.mxu0 %v2317_v10  ;;  %v2379_v6 = vld [vmem:[%s2998_s1 + $0x308] sm:$0xff]   ;;  %v2383_v10 = vld [vmem:[%s2998_s1 + $0x300] sm:$0xff]  }
  0x45   :  { %2130 = vmatpush3.bf16.msra.mxu1 %v2318_v11  ;;  %2109 = vmatprep.subr.bf16.mxu0 %v2319_v12  ;;  %v2384_v11 = vld [vmem:[%s2998_s1 + $0x380] sm:$0xff]  }
  0x46   :  { %2131 = vmatprep.subr.bf16.mxu1 %v2320_v13  ;;  %1618 = vmatprep.mubr.bf16.mxu0 %v2349_v41  ;;  %v2385_v12 = vld [vmem:[%s2999_s0 + $0x30] ss:$80 sps:$4 sm:$0xff]   ;;  %v2387_v13 = vld [vmem:[%s2999_s0 + $0x34] ss:$80 sps:$4 sm:$0xff]   ;;  %v2416_v41 = vld [vmem:[%s2998_s1 + $0x4c8] sm:$0xff]  }
  0x47   :  { %1659 = vmatprep.mubr.bf16.mxu1 %v2352_v43  ;;  %v2418_v43 = vld [vmem:[%s2998_s1 + $0x488] sm:$0xff]  }
  0x48   :  { %2110 = vmatpush3.bf16.msra.mxu0 %v2321_v14  ;;  %v2388_v14 = vld [vmem:[%s2999_s0 + $0x38] ss:$80 sps:$4 sm:$0xff]  }
  0x49   :  { %2132 = vmatpush3.bf16.msra.mxu1 %v2322_v15  ;;  %2111 = vmatprep.subr.bf16.mxu0 %v2323_v16  ;;  %v2390_v15 = vld [vmem:[%s2999_s0 + $0x3c] ss:$80 sps:$4 sm:$0xff]  }
  0x4a   :  { %2133 = vmatprep.subr.bf16.mxu1 %v2324_v17  ;;  %v2391_v16 = vld [vmem:[%s2998_s1 + $0x478] sm:$0xff]  }
  0x4b   :  { %v2392_v17 = vld [vmem:[%s2998_s1 + $0x4f8] sm:$0xff]  }
  0x4c   :  { %2112 = vmatpush3.bf16.msra.mxu0 %v2325_v18  ;;  %v2393_v18 = vld [vmem:[%s2998_s1 + $0x438] sm:$0xff]  }
  0x4d   :  { %2134 = vmatpush3.bf16.msra.mxu1 %v2326_v19  ;;  %2113 = vmatprep.subr.bf16.mxu0 %v2327_v20  ;;  %v2394_v19 = vld [vmem:[%s2998_s1 + $0x4b8] sm:$0xff]   ;;  %v2395_v20 = vld [vmem:[%s2998_s1 + $0x470] sm:$0xff]  }
  0x4e   :  { %2135 = vmatprep.subr.bf16.mxu1 %v2328_v21  ;;  %v2396_v21 = vld [vmem:[%s2998_s1 + $0x4f0] sm:$0xff]  }
  0x50   :  { %2114 = vmatpush3.bf16.msra.mxu0 %v2329_v22  ;;  %v2397_v22 = vld [vmem:[%s2998_s1 + $0x430] sm:$0xff]  }
  0x51   :  { %2136 = vmatpush3.bf16.msra.mxu1 %v2330_v23  ;;  %2115 = vmatprep.subr.bf16.mxu0 %v2331_v24  ;;  %v2398_v23 = vld [vmem:[%s2998_s1 + $0x4b0] sm:$0xff]   ;;  %v2399_v24 = vld [vmem:[%s2998_s1 + $0x468] sm:$0xff]  }
  0x52   :  { %2137 = vmatprep.subr.bf16.mxu1 %v2332_v25  ;;  %v2400_v25 = vld [vmem:[%s2998_s1 + $0x4e8] sm:$0xff]  }
  0x54   :  { %2116 = vmatpush3.bf16.msra.mxu0 %v2333_v26  ;;  %v2401_v26 = vld [vmem:[%s2998_s1 + $0x428] sm:$0xff]  }
  0x55   :  { %2138 = vmatpush3.bf16.msra.mxu1 %v2334_v27  ;;  %2117 = vmatprep.subr.bf16.mxu0 %v2335_v28  ;;  %v2402_v27 = vld [vmem:[%s2998_s1 + $0x4a8] sm:$0xff]   ;;  %v2403_v28 = vld [vmem:[%s2998_s1 + $0x460] sm:$0xff]  }
  0x56   :  { %2139 = vmatprep.subr.bf16.mxu1 %v2336_v29  ;;  %v2404_v29 = vld [vmem:[%s2998_s1 + $0x4e0] sm:$0xff]  }
  0x58   :  { %2118 = vmatpush3.bf16.msra.mxu0 %v2337_v30  ;;  %v2405_v30 = vld [vmem:[%s2998_s1 + $0x420] sm:$0xff]  }
  0x59   :  { %2140 = vmatpush3.bf16.msra.mxu1 %v2338_v31  ;;  %2119 = vmatprep.subr.bf16.mxu0 %v2339_v32  ;;  %v2406_v31 = vld [vmem:[%s2998_s1 + $0x4a0] sm:$0xff]   ;;  %v2407_v32 = vld [vmem:[%s2998_s1 + $0x458] sm:$0xff]  }
  0x5a   :  { %2141 = vmatprep.subr.bf16.mxu1 %v2340_v33  ;;  %v2408_v33 = vld [vmem:[%s2998_s1 + $0x4d8] sm:$0xff]  }
  0x5c   :  { %2120 = vmatpush3.bf16.msra.mxu0 %v2341_v34  ;;  %v2409_v34 = vld [vmem:[%s2998_s1 + $0x418] sm:$0xff]  }
  0x5d   :  { %2142 = vmatpush3.bf16.msra.mxu1 %v2342_v35  ;;  %2121 = vmatprep.subr.bf16.mxu0 %v2343_v36  ;;  %v2410_v35 = vld [vmem:[%s2998_s1 + $0x498] sm:$0xff]   ;;  %v2411_v36 = vld [vmem:[%s2998_s1 + $0x450] sm:$0xff]  }
  0x5e   :  { %2143 = vmatprep.subr.bf16.mxu1 %v2344_v37  ;;  %v2412_v37 = vld [vmem:[%s2998_s1 + $0x4d0] sm:$0xff]  }
  0x60   :  { %2122 = vmatpush3.bf16.msra.mxu0 %v2345_v38  ;;  %v2413_v38 = vld [vmem:[%s2998_s1 + $0x410] sm:$0xff]  }
  0x61   :  { %2144 = vmatpush3.bf16.msra.mxu1 %v2346_v39  ;;  %2151 = vmatprep.subr.bf16.mxu0 %v2353_v44  ;;  %v2414_v39 = vld [vmem:[%s2998_s1 + $0x490] sm:$0xff]   ;;  %v2419_v44 = vld [vmem:[%s2998_s1 + $0x440] sm:$0xff]  }
  0x62   :  { %2173 = vmatprep.subr.bf16.mxu1 %v2354_v45  ;;  %v2420_v45 = vld [vmem:[%s2998_s1 + $0x4c0] sm:$0xff]  }
  0x63   :  { %1619 = vmatmul.mubr.bf16.vlgmr.msra.gmra.mxu0 %v2347_v40  ;;  %v2415_v40 = vld [vmem:[%s2998_s1 + $0x448] sm:$0xff]  }
  0x64   :  { %1660 = vmatmul.mubr.bf16.vlgmr.msra.gmra.mxu1 %v2350_v42  ;;  %2152 = vmatpush3.bf16.msra.mxu0 %v2355_v46  ;;  %v2417_v42 = vld [vmem:[%s2998_s1 + $0x408] sm:$0xff]   ;;  %v2421_v46 = vld [vmem:[%s2998_s1 + $0x400] sm:$0xff]  }
  0x65   :  { %2174 = vmatpush3.bf16.msra.mxu1 %v2356_v47  ;;  %2153 = vmatprep.subr.bf16.mxu0 %v2357_v48  ;;  %v2422_v47 = vld [vmem:[%s2998_s1 + $0x480] sm:$0xff]  }
  0x66   :  { %2175 = vmatprep.subr.bf16.mxu1 %v2358_v49  ;;  %1700 = vmatprep.mubr.bf16.mxu0 %v2387_v13  ;;  %v2423_v48 = vld [vmem:[%s2999_s0 + $0x40] ss:$80 sps:$4 sm:$0xff]   ;;  %v2425_v49 = vld [vmem:[%s2999_s0 + $0x44] ss:$80 sps:$4 sm:$0xff]  }
  0x67   :  { %1741 = vmatprep.mubr.bf16.mxu1 %v2390_v15 }
  0x68   :  { %2154 = vmatpush3.bf16.msra.mxu0 %v2359_v50  ;;  %v2426_v50 = vld [vmem:[%s2999_s0 + $0x48] ss:$80 sps:$4 sm:$0xff]  }
  0x69   :  { %2176 = vmatpush3.bf16.msra.mxu1 %v2360_v51  ;;  %2155 = vmatprep.subr.bf16.mxu0 %v2361_v52  ;;  %v2428_v51 = vld [vmem:[%s2999_s0 + $0x4c] ss:$80 sps:$4 sm:$0xff]  }
  0x6a   :  { %2177 = vmatprep.subr.bf16.mxu1 %v2362_v53 }
  0x6c   :  { %2156 = vmatpush3.bf16.msra.mxu0 %v2363_v54 }
  0x6d   :  { %2178 = vmatpush3.bf16.msra.mxu1 %v2364_v55  ;;  %2157 = vmatprep.subr.bf16.mxu0 %v2365_v56 }
  0x6e   :  { %2179 = vmatprep.subr.bf16.mxu1 %v2366_v57 }
  0x70   :  { %2158 = vmatpush3.bf16.msra.mxu0 %v2367_v58 }
  0x71   :  { %2180 = vmatpush3.bf16.msra.mxu1 %v2368_v59  ;;  %2159 = vmatprep.subr.bf16.mxu0 %v2369_v60 }
  0x72   :  { %2181 = vmatprep.subr.bf16.mxu1 %v2370_v61 }
  0x74   :  { %2160 = vmatpush3.bf16.msra.mxu0 %v2371_v62 }
  0x75   :  { %2182 = vmatpush3.bf16.msra.mxu1 %v2372_v63  ;;  %2161 = vmatprep.subr.bf16.mxu0 %v2373_v0 }
  0x76   :  { %2183 = vmatprep.subr.bf16.mxu1 %v2374_v1 }
  0x78   :  { %2162 = vmatpush3.bf16.msra.mxu0 %v2375_v2 }
  0x79   :  { %2184 = vmatpush3.bf16.msra.mxu1 %v2376_v3  ;;  %2163 = vmatprep.subr.bf16.mxu0 %v2377_v4 }
  0x7a   :  { %2185 = vmatprep.subr.bf16.mxu1 %v2378_v5 }
  0x7c   :  { %2164 = vmatpush3.bf16.msra.mxu0 %v2379_v6 }
  0x7d   :  { %2186 = vmatpush3.bf16.msra.mxu1 %v2380_v7  ;;  %2165 = vmatprep.subr.bf16.mxu0 %v2381_v8  ;;  %v1838_v8 = vld [vmem:[%s3000_s2] ss:$0 sm:$0xff] }
  0x7e   :  { %2187 = vmatprep.subr.bf16.mxu1 %v2382_v9 }
  0x80   :  { %2166 = vmatpush3.bf16.msra.mxu0 %v2383_v10 }
  0x81   :  { %2188 = vmatpush3.bf16.msra.mxu1 %v2384_v11  ;;  %2195 = vmatprep.subr.bf16.mxu0 %v2391_v16 }
  0x82   :  { %2217 = vmatprep.subr.bf16.mxu1 %v2392_v17 }
  0x83   :  { %1701 = vmatmul.mubr.bf16.vlgmr.msra.gmra.mxu0 %v2385_v12 }
  0x84   :  { %1742 = vmatmul.mubr.bf16.vlgmr.msra.gmra.mxu1 %v2388_v14  ;;  %2196 = vmatpush3.bf16.msra.mxu0 %v2393_v18 }
  0x85   :  { %2218 = vmatpush3.bf16.msra.mxu1 %v2394_v19  ;;  %2197 = vmatprep.subr.bf16.mxu0 %v2395_v20 }
  0x86   :  { %2219 = vmatprep.subr.bf16.mxu1 %v2396_v21  ;;  %1782 = vmatprep.mubr.bf16.mxu0 %v2425_v49 }
  0x87   :  { %1823 = vmatprep.mubr.bf16.mxu1 %v2428_v51 }
  0x88   :  { %2198 = vmatpush3.bf16.msra.mxu0 %v2397_v22 }
  0x89   :  { %2220 = vmatpush3.bf16.msra.mxu1 %v2398_v23  ;;  %2199 = vmatprep.subr.bf16.mxu0 %v2399_v24 }
  0x8a   :  { %2221 = vmatprep.subr.bf16.mxu1 %v2400_v25 }
  0x8c   :  { %2200 = vmatpush3.bf16.msra.mxu0 %v2401_v26 }
  0x8d   :  { %2222 = vmatpush3.bf16.msra.mxu1 %v2402_v27  ;;  %2201 = vmatprep.subr.bf16.mxu0 %v2403_v28 }
  0x8e   :  { %2223 = vmatprep.subr.bf16.mxu1 %v2404_v29 }
  0x90   :  { %2202 = vmatpush3.bf16.msra.mxu0 %v2405_v30 }
  0x91   :  { %2224 = vmatpush3.bf16.msra.mxu1 %v2406_v31  ;;  %2203 = vmatprep.subr.bf16.mxu0 %v2407_v32 }
  0x92   :  { %2225 = vmatprep.subr.bf16.mxu1 %v2408_v33 }
  0x94   :  { %2204 = vmatpush3.bf16.msra.mxu0 %v2409_v34 }
  0x95   :  { %2226 = vmatpush3.bf16.msra.mxu1 %v2410_v35  ;;  %2205 = vmatprep.subr.bf16.mxu0 %v2411_v36 }
  0x96   :  { %2227 = vmatprep.subr.bf16.mxu1 %v2412_v37 }
  0x98   :  { %2206 = vmatpush3.bf16.msra.mxu0 %v2413_v38 }
  0x99   :  { %2228 = vmatpush3.bf16.msra.mxu1 %v2414_v39  ;;  %2207 = vmatprep.subr.bf16.mxu0 %v2415_v40 }
  0x9a   :  { %2229 = vmatprep.subr.bf16.mxu1 %v2416_v41 }
  0x9c   :  { %2208 = vmatpush3.bf16.msra.mxu0 %v2417_v42 }
  0x9d   :  { %2230 = vmatpush3.bf16.msra.mxu1 %v2418_v43  ;;  %2209 = vmatprep.subr.bf16.mxu0 %v2419_v44 }
  0x9e   :  { %2231 = vmatprep.subr.bf16.mxu1 %v2420_v45 }
  0xa0   :  { %2210 = vmatpush3.bf16.msra.mxu0 %v2421_v46 }
  0xa1   :  { %2232 = vmatpush3.bf16.msra.mxu1 %v2422_v47 }
  0xa3   :  { %1783 = vmatmul.mubr.bf16.vlgmr.msra.gmra.mxu0 %v2423_v48 }
  0xa4   :  { %1824 = vmatmul.mubr.bf16.vlgmr.msra.gmra.mxu1 %v2426_v50 }
  0xe3   :  { %v2035_v52 = vpop.f32.mrf.mxu0 }
  0xe4   :  { %v2057_v53 = vpop.f32.mrf.mxu1 }
  0xe5   :  { %v2036_v54 = vpop.f32.mrf.mxu0 }
  0xe6   :  { %v2058_v55 = vpop.f32.mrf.mxu1  ;;  %v2037_v7 = vadd.f32 %v2036_v54, %v2035_v52 }
  0xe7   :  { %v2038_v56 = vpop.f32.mrf.mxu0  ;;  %v2059_v12 = vadd.f32 %v2058_v55, %v2057_v53 }
  0xe8   :  { %v2060_v57 = vpop.f32.mrf.mxu1  ;;  %v1457_v11 = vadd.f32 %v2037_v7, %v1838_v8 }
  0xe9   :  { %v2039_v58 = vpop.f32.mrf.mxu0 }
  0xea   :  { %v2061_v60 = vpop.f32.mrf.mxu1  ;;  %v2040_v13 = vadd.f32 %v2039_v58, %v2038_v56  ;;  %v1498_v18 = vadd.f32 %v2059_v12, %v1457_v11 }
  0xeb   :  { %v2062_v21 = vadd.f32 %v2061_v60, %v2060_v57 }
  0xec   :  { %v1460_v19 = vadd.f32 %v2040_v13, %v1838_v8 }
  0xee   :  { %v1501_v27 = vadd.f32 %v2062_v21, %v1460_v19 }
 0x103   :  { %v2079_v59 = vpop.f32.mrf.mxu0 }
 0x104   :  { %v2101_v61 = vpop.f32.mrf.mxu1 }
 0x105   :  { %v2080_v62 = vpop.f32.mrf.mxu0 }
 0x106   :  { %v2102_v63 = vpop.f32.mrf.mxu1  ;;  %v2081_v16 = vadd.f32 %v2080_v62, %v2079_v59 }
 0x107   :  { %v2082_v0 = vpop.f32.mrf.mxu0  ;;  %v2103_v23 = vadd.f32 %v2102_v63, %v2101_v61 }
 0x108   :  { %v2104_v1 = vpop.f32.mrf.mxu1  ;;  %v1539_v22 = vadd.f32 %v2081_v16, %v1498_v18 }
 0x109   :  { %v2083_v2 = vpop.f32.mrf.mxu0 }
 0x10a   :  { %v2105_v4 = vpop.f32.mrf.mxu1  ;;  %v2084_v24 = vadd.f32 %v2083_v2, %v2082_v0  ;;  %v1580_v29 = vadd.f32 %v2103_v23, %v1539_v22 }
 0x10b   :  { %v2106_v33 = vadd.f32 %v2105_v4, %v2104_v1 }
 0x10c   :  { %v1542_v30 = vadd.f32 %v2084_v24, %v1501_v27 }
 0x10e   :  { %v1583_v37 = vadd.f32 %v2106_v33, %v1542_v30 }
 0x123   :  { %v2123_v3 = vpop.f32.mrf.mxu0 }
 0x124   :  { %v2145_v5 = vpop.f32.mrf.mxu1 }
 0x125   :  { %v2124_v6 = vpop.f32.mrf.mxu0 }
 0x126   :  { %v2146_v9 = vpop.f32.mrf.mxu1  ;;  %v2125_v28 = vadd.f32 %v2124_v6, %v2123_v3 }
 0x127   :  { %v2126_v10 = vpop.f32.mrf.mxu0  ;;  %v2147_v35 = vadd.f32 %v2146_v9, %v2145_v5 }
 0x128   :  { %v2148_v14 = vpop.f32.mrf.mxu1  ;;  %v1621_v34 = vadd.f32 %v2125_v28, %v1580_v29 }
 0x129   :  { %v2127_v15 = vpop.f32.mrf.mxu0 }
 0x12a   :  { %v2149_v20 = vpop.f32.mrf.mxu1  ;;  %v2128_v36 = vadd.f32 %v2127_v15, %v2126_v10  ;;  %v1662_v41 = vadd.f32 %v2147_v35, %v1621_v34 }
 0x12b   :  { %v2150_v43 = vadd.f32 %v2149_v20, %v2148_v14 }
 0x12c   :  { %v1624_v42 = vadd.f32 %v2128_v36, %v1583_v37 }
 0x12e   :  { %v1665_v49 = vadd.f32 %v2150_v43, %v1624_v42 }
 0x143   :  { %v2167_v17 = vpop.f32.mrf.mxu0 }
 0x144   :  { %v2189_v25 = vpop.f32.mrf.mxu1 }
 0x145   :  { %v2168_v26 = vpop.f32.mrf.mxu0 }
 0x146   :  { %v2190_v31 = vpop.f32.mrf.mxu1  ;;  %v2169_v38 = vadd.f32 %v2168_v26, %v2167_v17 }
 0x147   :  { %v2170_v32 = vpop.f32.mrf.mxu0  ;;  %v2191_v45 = vadd.f32 %v2190_v31, %v2189_v25 }
 0x148   :  { %v2192_v39 = vpop.f32.mrf.mxu1  ;;  %v1703_v44 = vadd.f32 %v2169_v38, %v1662_v41 }
 0x149   :  { %v2171_v40 = vpop.f32.mrf.mxu0 }
 0x14a   :  { %v2172_v46 = vadd.f32 %v2171_v40, %v2170_v32  ;;  %v2193_v47 = vpop.f32.mrf.mxu1  ;;  %v1744_v52 = vadd.f32 %v2191_v45, %v1703_v44 }
 0x14b   :  { %v2194_v57 = vadd.f32 %v2193_v47, %v2192_v39 }
 0x14c   :  { %v1706_v53 = vadd.f32 %v2172_v46, %v1665_v49 }
 0x14e   :  { %v1747_v62 = vadd.f32 %v2194_v57, %v1706_v53 }
 0x163   :  { %v2211_v48 = vpop.f32.mrf.mxu0 }
 0x164   :  { %v2233_v50 = vpop.f32.mrf.mxu1 }
 0x165   :  { %v2212_v51 = vpop.f32.mrf.mxu0 }
 0x166   :  { %v2213_v54 = vadd.f32 %v2212_v51, %v2211_v48  ;;  %v2234_v55 = vpop.f32.mrf.mxu1 }
 0x167   :  { %v2214_v56 = vpop.f32.mrf.mxu0  ;;  %v2235_v59 = vadd.f32 %v2234_v55, %v2233_v50 }
 0x168   :  { %v1785_v58 = vadd.f32 %v2213_v54, %v1744_v52  ;;  %v2236_v60 = vpop.f32.mrf.mxu1 }
 0x169   :  { %v2215_v61 = vpop.f32.mrf.mxu0 }
 0x16a   :  { %v1826_v63 = vadd.f32 %v2235_v59, %v1785_v58  ;;  %v2216_v0 = vadd.f32 %v2215_v61, %v2214_v56  ;;  %v2237_v1 = vpop.f32.mrf.mxu1 }
 0x16b   :  { %v2238_v3 = vadd.f32 %v2237_v1, %v2236_v60 }
 0x16c   :  { %1832 = vst [vmem:[%s3001_s3] sm:$0xff] %v1826_v63  ;;  %v1788_v2 = vadd.f32 %v2216_v0, %v1747_v62 }
 0x16e   :  { %v1829_v4 = vadd.f32 %v2238_v3, %v1788_v2 }
 0x170   :  { %1833 = vst [vmem:[%s3001_s3 + $0x8] sm:$0xff] %v1829_v4 }

</bundles_post_ra>
